<compile_context>
chip_gen: v5e
topology: v5e:2x2
jax: 0.10.0
libtpu: 0.0.40
codegen_flags: <defaults>
</compile_context>

<pallas_src>
import math
import functools

import jax
import jax.numpy as jnp
from jax.experimental import pallas as pl
from jax.experimental.pallas import tpu as pltpu

# ----------------------------- model config ---------------------------------
B = 2          # number of "texts"
S = 8          # tokens per text
H = 32         # hidden size
NH = 4         # attention heads
HD = H // NH   # head dim
FFN = 64       # intermediate (FFN) size
LAYERS = 2     # encoder layers
VOCAB = 64     # vocab size
MAXPOS = 16    # max position embeddings
LN_EPS = 1e-12


# ------------------------------ kernel helpers -------------------------------
def _layernorm(x, g, b, eps=LN_EPS):
    m = jnp.mean(x, axis=-1, keepdims=True)
    c = x - m
    v = jnp.mean(c * c, axis=-1, keepdims=True)
    return c * jax.lax.rsqrt(v + eps) * g + b


def _gelu(x):
    # TODO(synk): HF BERT uses exact (erf) GELU; tanh approximation used here.
    return 0.5 * x * (1.0 + jnp.tanh(0.7978845608028654 * (x + 0.044715 * x * x * x)))


# ------------------------------ fused Pallas kernel ---------------------------
def bert_fused_kernel(x_ref, eg_ref, eb_ref,
                      wqkv_ref, bqkv_ref, wo_ref, bo_ref,
                      l1g_ref, l1b_ref,
                      w1_ref, b1_ref, w2_ref, b2_ref,
                      l2g_ref, l2b_ref,
                      pw_ref, pb_ref,
                      hid_ref, pool_ref,
                      *, num_layers, num_heads, seq, hidden):
    """Embedding LN -> `num_layers` encoder layers -> pooler, one text per grid step."""
    hd = hidden // num_heads

    # embedding LayerNorm; x_ref block is (1, S, H)
    h = _layernorm(x_ref[0].astype(jnp.float32), eg_ref[...], eb_ref[...])   # (S, H) f32

    # encoder layers (unrolled: LAYERS small; weights indexed statically)
    for l in range(num_layers):
        # ---- self-attention: fused QKV projection, 1/sqrt(hd) folded into Wq/bq ----
        qkv = jnp.dot(h.astype(jnp.bfloat16), wqkv_ref[l],
                      preferred_element_type=jnp.float32) + bqkv_ref[l]       # (S, 3H) f32

        q = qkv[:, :hidden].reshape(seq, num_heads, hd)
        k = qkv[:, hidden:2 * hidden].reshape(seq, num_heads, hd)
        v = qkv[:, 2 * hidden:].reshape(seq, num_heads, hd)
        qh = jnp.transpose(q, (1, 0, 2)).astype(jnp.bfloat16)                 # (NH, S, HD)
        kh = jnp.transpose(k, (1, 0, 2)).astype(jnp.bfloat16)
        vh = jnp.transpose(v, (1, 0, 2)).astype(jnp.bfloat16)

        # scores (NH, S, S); no mask: all sequences are exactly full length.
        s = jax.lax.dot_general(qh, kh, (((2,), (2,)), ((0,), (0,))),
                                preferred_element_type=jnp.float32)
        m = jnp.max(s, axis=-1, keepdims=True)
        e = jnp.exp(s - m)
        # approx reciprocal runs on the EUP slot; ~1e-3 relative tolerance vs exact divide.
        p = e * pl.reciprocal(jnp.sum(e, axis=-1, keepdims=True), approx=True)

        ctx = jax.lax.dot_general(p.astype(jnp.bfloat16), vh,
                                  (((2,), (1,)), ((0,), (0,))),
                                  preferred_element_type=jnp.float32)         # (NH, S, HD)
        ctx = jnp.transpose(ctx, (1, 0, 2)).reshape(seq, hidden)              # (S, H)

        # output projection: single (S,H) @ (H,H) matmul, canonical layout
        attn = jnp.dot(ctx.astype(jnp.bfloat16), wo_ref[l],
                       preferred_element_type=jnp.float32) + bo_ref[l]
        h = _layernorm(h + attn, l1g_ref[l], l1b_ref[l])

        # ---- feed-forward ----
        ff = jnp.dot(h.astype(jnp.bfloat16), w1_ref[l],
                     preferred_element_type=jnp.float32) + b1_ref[l]
        ff = _gelu(ff)
        ff = jnp.dot(ff.astype(jnp.bfloat16), w2_ref[l],
                     preferred_element_type=jnp.float32) + b2_ref[l]
        h = _layernorm(h + ff, l2g_ref[l], l2b_ref[l])

    hid_ref[0] = h.astype(hid_ref.dtype)

    # ---- pooler: tanh(CLS @ Wp + bp); CLS is row 0 of this text's block ----
    cls = h[0:1, :]                                                           # (1, H)
    pooled = jnp.dot(cls.astype(jnp.bfloat16), pw_ref[...],
                     preferred_element_type=jnp.float32) + pb_ref[...]
    pool_ref[0] = jnp.tanh(pooled).astype(pool_ref.dtype)


# ------------------------------ pallas_call wrapper ---------------------------
def bert_forward_call(emb, params, *, batch, seq):
    hidden = emb.shape[-1]
    vmem = pl.BlockSpec(memory_space=pltpu.MemorySpace.VMEM)   # whole-array VMEM resident
    kernel = functools.partial(bert_fused_kernel, num_layers=LAYERS,
                               num_heads=NH, seq=seq, hidden=hidden)
    hid, pooled = pl.pallas_call(
        kernel,
        grid=(batch,),
        out_shape=(jax.ShapeDtypeStruct((batch, seq, hidden), jnp.float32),   # last hidden
                   jax.ShapeDtypeStruct((batch, 1, hidden), jnp.float32)),    # pooled
        in_specs=[pl.BlockSpec((1, seq, hidden), lambda b: (b, 0, 0))] + [vmem] * 16,
        out_specs=(pl.BlockSpec((1, seq, hidden), lambda b: (b, 0, 0)),
                   pl.BlockSpec((1, 1, hidden), lambda b: (b, 0, 0))),
        compiler_params=pltpu.CompilerParams(
            dimension_semantics=("parallel",)),   # shards over 2 TCs on v7x
    )(emb,
      params["emb_ln_g"], params["emb_ln_b"],
      params["wqkv"], params["bqkv"], params["wo"], params["bo"],
      params["ln1_g"], params["ln1_b"],
      params["w1"], params["b1"], params["w2"], params["b2"],
      params["ln2_g"], params["ln2_b"],
      params["pool_w"], params["pool_b"])
    return hid, pooled


# ------------------------------ the BERT wrapper ------------------------------
class BERTPallas:
    """Pallas reimplementation of the BERT text-embedding wrapper forward."""

    def __init__(self, key="pooler_output", rng=jax.random.PRNGKey(0)):
        assert key in ("pooler_output", "last_hidden_state")
        self.key = key
        std = 0.02
        scale = 1.0 / math.sqrt(HD)

        def nrm(k, shape):
            return (std * jax.random.normal(k, shape)).astype(jnp.float32)

        keys = iter(jax.random.split(rng, 4 + LAYERS * 6))

        # embeddings (lookup stays in plain JAX glue)
        self.word_emb = nrm(next(keys), (VOCAB, H))
        self.pos_emb = nrm(next(keys), (MAXPOS, H))
        self.type_emb = nrm(next(keys), (2, H))

        # encoder layers: canonical (in, out) weights; QKV fused with the
        # attention scale folded into Wq / bq at parameter-prep time.
        layers = []
        for _ in range(LAYERS):
            wq, wk, wv = nrm(next(keys), (H, H)), nrm(next(keys), (H, H)), nrm(next(keys), (H, H))
            bq = bk = bv = jnp.zeros((1, H), jnp.float32)
            layers.append(dict(
                wqkv=jnp.concatenate([wq * scale, wk, wv], axis=1),           # (H, 3H)
                bqkv=jnp.concatenate([bq * scale, bk, bv], axis=1),           # (1, 3H)
                wo=nrm(next(keys), (H, H)), bo=jnp.zeros((1, H), jnp.float32),
                ln1_g=jnp.ones((1, H), jnp.float32),
                ln1_b=jnp.zeros((1, H), jnp.float32),
                w1=nrm(next(keys), (H, FFN)), b1=jnp.zeros((1, FFN), jnp.float32),
                w2=nrm(next(keys), (FFN, H)), b2=jnp.zeros((1, H), jnp.float32),
                ln2_g=jnp.ones((1, H), jnp.float32),
                ln2_b=jnp.zeros((1, H), jnp.float32),
            ))

        def stack(name, dtype=jnp.float32):
            return jnp.stack([p[name] for p in layers]).astype(dtype)

        # matmul weights in bf16 (MXU-native on v6e/v7x, halves bytes on v5e);
        # biases / LN params stay f32 (added to f32 accumulators).
        self.params = dict(
            emb_ln_g=jnp.ones((1, H), jnp.float32),
            emb_ln_b=jnp.zeros((1, H), jnp.float32),
            wqkv=stack("wqkv", jnp.bfloat16), bqkv=stack("bqkv"),
            wo=stack("wo", jnp.bfloat16), bo=stack("bo"),
            ln1_g=stack("ln1_g"), ln1_b=stack("ln1_b"),
            w1=stack("w1", jnp.bfloat16), b1=stack("b1"),
            w2=stack("w2", jnp.bfloat16), b2=stack("b2"),
            ln2_g=stack("ln2_g"), ln2_b=stack("ln2_b"),
            pool_w=nrm(next(keys), (H, H)).astype(jnp.bfloat16),
            pool_b=jnp.zeros((1, H), jnp.float32),
        )

    def __call__(self, input_ids):
        # input_ids: (B, S) int32, one row per "text".  Equal sequence lengths
        # => batching equals the per-text forward + concat of the torch module.
        bB, bS = input_ids.shape
        emb = (jnp.take(self.word_emb, input_ids, axis=0)
               + self.pos_emb[None, :bS, :]
               + self.type_emb[0][None, None, :]).astype(jnp.float32)         # (B, S, H)
        hid, pooled = bert_forward_call(emb, self.params, batch=bB, seq=bS)
        if self.key == "pooler_output":
            return pooled.reshape(bB, H)                 # (B, H)
        return hid[:, 0, :]                              # last_hidden_state[:, 0]


# ----------------------------------- main ------------------------------------
if __name__ == "__main__":
    root = jax.random.PRNGKey(0)
    k_ids, k_params = jax.random.split(root)

    # deterministic "tokenized texts": (B, S) token ids, position 0 = CLS
    input_ids = jax.random.randint(k_ids, (B, S), 2, VOCAB, dtype=jnp.int32)
    input_ids = input_ids.at[:, 0].set(1)

    model = BERTPallas(key="pooler_output", rng=k_params)
    out = model(input_ids)
    jax.block_until_ready(out)

    assert out.shape == (B, H) and out.dtype == jnp.float32
    assert bool(jnp.all(jnp.isfinite(out)))

    # also exercise the 'last_hidden_state' branch
    model_lhs = BERTPallas(key="last_hidden_state", rng=k_params)
    out2 = model_lhs(input_ids)
    jax.block_until_ready(out2)
    assert out2.shape == (B, H)
    assert bool(jnp.all(jnp.isfinite(out2)))

    print("KERNEL_OK")
</pallas_src>

<mosaic_0001>
module attributes {stable_mosaic.version = 11 : i64} {
  func.func @bert_fused_kernel(%arg0: i32, %arg1: memref<1x8x32xf32, #tpu.memory_space<vmem>>, %arg2: memref<1x32xf32, #tpu.memory_space<vmem>>, %arg3: memref<1x32xf32, #tpu.memory_space<vmem>>, %arg4: memref<2x32x96xbf16, #tpu.memory_space<vmem>>, %arg5: memref<2x1x96xf32, #tpu.memory_space<vmem>>, %arg6: memref<2x32x32xbf16, #tpu.memory_space<vmem>>, %arg7: memref<2x1x32xf32, #tpu.memory_space<vmem>>, %arg8: memref<2x1x32xf32, #tpu.memory_space<vmem>>, %arg9: memref<2x1x32xf32, #tpu.memory_space<vmem>>, %arg10: memref<2x32x64xbf16, #tpu.memory_space<vmem>>, %arg11: memref<2x1x64xf32, #tpu.memory_space<vmem>>, %arg12: memref<2x64x32xbf16, #tpu.memory_space<vmem>>, %arg13: memref<2x1x32xf32, #tpu.memory_space<vmem>>, %arg14: memref<2x1x32xf32, #tpu.memory_space<vmem>>, %arg15: memref<2x1x32xf32, #tpu.memory_space<vmem>>, %arg16: memref<32x32xbf16, #tpu.memory_space<vmem>>, %arg17: memref<1x32xf32, #tpu.memory_space<vmem>>, %arg18: memref<1x8x32xf32, #tpu.memory_space<vmem>>, %arg19: memref<1x1x32xf32, #tpu.memory_space<vmem>>) attributes {dimension_semantics = [#tpu.dimension_semantics<parallel>], iteration_bounds = array<i64: 2>, scalar_prefetch = 0 : i64, scratch_operands = 0 : i64, tpu.core_type = #tpu.core_type<tc>, window_params = [{transform_indices = @transform_0, window_bounds = array<i64: 1, 8, 32>}, {pipeline_mode = #tpu.pipeline_mode<synchronous>, transform_indices = @transform_1, window_bounds = array<i64: 1, 32>}, {pipeline_mode = #tpu.pipeline_mode<synchronous>, transform_indices = @transform_2, window_bounds = array<i64: 1, 32>}, {pipeline_mode = #tpu.pipeline_mode<synchronous>, transform_indices = @transform_3, window_bounds = array<i64: 2, 32, 96>}, {pipeline_mode = #tpu.pipeline_mode<synchronous>, transform_indices = @transform_4, window_bounds = array<i64: 2, 1, 96>}, {pipeline_mode = #tpu.pipeline_mode<synchronous>, transform_indices = @transform_5, window_bounds = array<i64: 2, 32, 32>}, {pipeline_mode = #tpu.pipeline_mode<synchronous>, transform_indices = @transform_6, window_bounds = array<i64: 2, 1, 32>}, {pipeline_mode = #tpu.pipeline_mode<synchronous>, transform_indices = @transform_7, window_bounds = array<i64: 2, 1, 32>}, {pipeline_mode = #tpu.pipeline_mode<synchronous>, transform_indices = @transform_8, window_bounds = array<i64: 2, 1, 32>}, {pipeline_mode = #tpu.pipeline_mode<synchronous>, transform_indices = @transform_9, window_bounds = array<i64: 2, 32, 64>}, {pipeline_mode = #tpu.pipeline_mode<synchronous>, transform_indices = @transform_10, window_bounds = array<i64: 2, 1, 64>}, {pipeline_mode = #tpu.pipeline_mode<synchronous>, transform_indices = @transform_11, window_bounds = array<i64: 2, 64, 32>}, {pipeline_mode = #tpu.pipeline_mode<synchronous>, transform_indices = @transform_12, window_bounds = array<i64: 2, 1, 32>}, {pipeline_mode = #tpu.pipeline_mode<synchronous>, transform_indices = @transform_13, window_bounds = array<i64: 2, 1, 32>}, {pipeline_mode = #tpu.pipeline_mode<synchronous>, transform_indices = @transform_14, window_bounds = array<i64: 2, 1, 32>}, {pipeline_mode = #tpu.pipeline_mode<synchronous>, transform_indices = @transform_15, window_bounds = array<i64: 32, 32>}, {pipeline_mode = #tpu.pipeline_mode<synchronous>, transform_indices = @transform_16, window_bounds = array<i64: 1, 32>}, {transform_indices = @transform_17, window_bounds = array<i64: 1, 8, 32>}, {transform_indices = @transform_18, window_bounds = array<i64: 1, 1, 32>}]} {
    %c0 = arith.constant 0 : index
    %c0_0 = arith.constant 0 : index
    %c0_1 = arith.constant 0 : index
    %0 = vector.load %arg1[%c0, %c0_0, %c0_1] : memref<1x8x32xf32, #tpu.memory_space<vmem>>, vector<1x8x32xf32>
    %1 = vector.shape_cast %0 : vector<1x8x32xf32> to vector<8x32xf32>
    %c0_2 = arith.constant 0 : index
    %c0_3 = arith.constant 0 : index
    %2 = vector.load %arg2[%c0_2, %c0_3] : memref<1x32xf32, #tpu.memory_space<vmem>>, vector<1x32xf32>
    %c0_4 = arith.constant 0 : index
    %c0_5 = arith.constant 0 : index
    %3 = vector.load %arg3[%c0_4, %c0_5] : memref<1x32xf32, #tpu.memory_space<vmem>>, vector<1x32xf32>
    %cst = arith.constant dense<0.000000e+00> : vector<8xf32>
    %4 = vector.multi_reduction <add>, %1, %cst [1] : vector<8x32xf32> to vector<8xf32>
    %5 = vector.shape_cast %4 : vector<8xf32> to vector<8x1xf32>
    %cst_6 = arith.constant 3.200000e+01 : f32
    %6 = vector.broadcast %cst_6 : f32 to vector<8x1xf32>
    %7 = arith.divf %5, %6 : vector<8x1xf32>
    %8 = vector.broadcast %7 : vector<8x1xf32> to vector<8x32xf32>
    %9 = arith.subf %1, %8 : vector<8x32xf32>
    %10 = arith.mulf %9, %9 : vector<8x32xf32>
    %cst_7 = arith.constant dense<0.000000e+00> : vector<8xf32>
    %11 = vector.multi_reduction <add>, %10, %cst_7 [1] : vector<8x32xf32> to vector<8xf32>
    %12 = vector.shape_cast %11 : vector<8xf32> to vector<8x1xf32>
    %cst_8 = arith.constant 3.200000e+01 : f32
    %13 = vector.broadcast %cst_8 : f32 to vector<8x1xf32>
    %14 = arith.divf %12, %13 : vector<8x1xf32>
    %cst_9 = arith.constant 9.99999996E-13 : f32
    %15 = vector.broadcast %cst_9 : f32 to vector<8x1xf32>
    %16 = arith.addf %14, %15 : vector<8x1xf32>
    %17 = math.rsqrt %16 : vector<8x1xf32>
    %18 = vector.broadcast %17 : vector<8x1xf32> to vector<8x32xf32>
    %19 = arith.mulf %9, %18 : vector<8x32xf32>
    %20 = vector.broadcast %2 : vector<1x32xf32> to vector<8x32xf32>
    %21 = arith.mulf %19, %20 : vector<8x32xf32>
    %22 = vector.broadcast %3 : vector<1x32xf32> to vector<8x32xf32>
    %23 = arith.addf %21, %22 : vector<8x32xf32>
    %24 = arith.truncf %23 : vector<8x32xf32> to vector<8x32xbf16>
    %c0_10 = arith.constant 0 : index
    %c0_11 = arith.constant 0 : index
    %c0_12 = arith.constant 0 : index
    %25 = vector.load %arg4[%c0_10, %c0_11, %c0_12] : memref<2x32x96xbf16, #tpu.memory_space<vmem>>, vector<1x32x96xbf16>
    %26 = vector.shape_cast %25 : vector<1x32x96xbf16> to vector<32x96xbf16>
    %cst_13 = arith.constant dense<0.000000e+00> : vector<8x96xf32>
    %27 = tpu.matmul %24, %26, %cst_13 {dimension_numbers = #tpu.dot_dimension_numbers<[1], [0], [0], [1], [0, 0, 1, 1], [], []>} : vector<8x32xbf16>, vector<32x96xbf16>, vector<8x96xf32> -> vector<8x96xf32>
    %c0_14 = arith.constant 0 : index
    %c0_15 = arith.constant 0 : index
    %c0_16 = arith.constant 0 : index
    %28 = vector.load %arg5[%c0_14, %c0_15, %c0_16] : memref<2x1x96xf32, #tpu.memory_space<vmem>>, vector<1x1x96xf32>
    %29 = vector.shape_cast %28 : vector<1x1x96xf32> to vector<1x96xf32>
    %30 = vector.broadcast %29 : vector<1x96xf32> to vector<8x96xf32>
    %31 = arith.addf %27, %30 : vector<8x96xf32>
    %32 = vector.extract_strided_slice %31 {offsets = [0, 0], sizes = [8, 32], strides = [1, 1]} : vector<8x96xf32> to vector<8x32xf32>
    %33 = vector.shape_cast %32 : vector<8x32xf32> to vector<8x4x8xf32>
    %34 = vector.extract_strided_slice %31 {offsets = [0, 32], sizes = [8, 32], strides = [1, 1]} : vector<8x96xf32> to vector<8x32xf32>
    %35 = vector.shape_cast %34 : vector<8x32xf32> to vector<8x4x8xf32>
    %36 = vector.extract_strided_slice %31 {offsets = [0, 64], sizes = [8, 32], strides = [1, 1]} : vector<8x96xf32> to vector<8x32xf32>
    %37 = vector.shape_cast %36 : vector<8x32xf32> to vector<8x4x8xf32>
    %38 = tpu.transpose %33, [1, 0, 2] : vector<8x4x8xf32> -> vector<4x8x8xf32>
    %39 = arith.truncf %38 : vector<4x8x8xf32> to vector<4x8x8xbf16>
    %40 = tpu.transpose %35, [1, 0, 2] : vector<8x4x8xf32> -> vector<4x8x8xf32>
    %41 = arith.truncf %40 : vector<4x8x8xf32> to vector<4x8x8xbf16>
    %42 = tpu.transpose %37, [1, 0, 2] : vector<8x4x8xf32> -> vector<4x8x8xf32>
    %43 = arith.truncf %42 : vector<4x8x8xf32> to vector<4x8x8xbf16>
    %cst_17 = arith.constant dense<0.000000e+00> : vector<4x8x8xf32>
    %44 = tpu.matmul %39, %41, %cst_17 {dimension_numbers = #tpu.dot_dimension_numbers<[2], [2], [1], [1], [0, 0, 0, 1, 1, 1], [0], [0]>} : vector<4x8x8xbf16>, vector<4x8x8xbf16>, vector<4x8x8xf32> -> vector<4x8x8xf32>
    %cst_18 = arith.constant dense<0xFF800000> : vector<4x8xf32>
    %45 = vector.multi_reduction <maximumf>, %44, %cst_18 [2] : vector<4x8x8xf32> to vector<4x8xf32>
    %46 = vector.shape_cast %45 : vector<4x8xf32> to vector<4x8x1xf32>
    %47 = vector.broadcast %46 : vector<4x8x1xf32> to vector<4x8x8xf32>
    %48 = arith.subf %44, %47 : vector<4x8x8xf32>
    %49 = math.exp %48 : vector<4x8x8xf32>
    %cst_19 = arith.constant dense<0.000000e+00> : vector<4x8xf32>
    %50 = vector.multi_reduction <add>, %49, %cst_19 [2] : vector<4x8x8xf32> to vector<4x8xf32>
    %51 = vector.shape_cast %50 : vector<4x8xf32> to vector<4x8x1xf32>
    %52 = tpu.reciprocal %51 {approx = true} : vector<4x8x1xf32> -> vector<4x8x1xf32>
    %53 = vector.broadcast %52 : vector<4x8x1xf32> to vector<4x8x8xf32>
    %54 = arith.mulf %49, %53 : vector<4x8x8xf32>
    %55 = arith.truncf %54 : vector<4x8x8xf32> to vector<4x8x8xbf16>
    %cst_20 = arith.constant dense<0.000000e+00> : vector<4x8x8xf32>
    %56 = tpu.matmul %55, %43, %cst_20 {dimension_numbers = #tpu.dot_dimension_numbers<[2], [1], [1], [2], [0, 0, 0, 1, 1, 2], [0], [0]>} : vector<4x8x8xbf16>, vector<4x8x8xbf16>, vector<4x8x8xf32> -> vector<4x8x8xf32>
    %57 = tpu.transpose %56, [1, 0, 2] : vector<4x8x8xf32> -> vector<8x4x8xf32>
    %58 = vector.shape_cast %57 : vector<8x4x8xf32> to vector<8x32xf32>
    %59 = arith.truncf %58 : vector<8x32xf32> to vector<8x32xbf16>
    %c0_21 = arith.constant 0 : index
    %c0_22 = arith.constant 0 : index
    %c0_23 = arith.constant 0 : index
    %60 = vector.load %arg6[%c0_21, %c0_22, %c0_23] : memref<2x32x32xbf16, #tpu.memory_space<vmem>>, vector<1x32x32xbf16>
    %61 = vector.shape_cast %60 : vector<1x32x32xbf16> to vector<32x32xbf16>
    %cst_24 = arith.constant dense<0.000000e+00> : vector<8x32xf32>
    %62 = tpu.matmul %59, %61, %cst_24 {dimension_numbers = #tpu.dot_dimension_numbers<[1], [0], [0], [1], [0, 0, 1, 1], [], []>} : vector<8x32xbf16>, vector<32x32xbf16>, vector<8x32xf32> -> vector<8x32xf32>
    %c0_25 = arith.constant 0 : index
    %c0_26 = arith.constant 0 : index
    %c0_27 = arith.constant 0 : index
    %63 = vector.load %arg7[%c0_25, %c0_26, %c0_27] : memref<2x1x32xf32, #tpu.memory_space<vmem>>, vector<1x1x32xf32>
    %64 = vector.shape_cast %63 : vector<1x1x32xf32> to vector<1x32xf32>
    %65 = vector.broadcast %64 : vector<1x32xf32> to vector<8x32xf32>
    %66 = arith.addf %62, %65 : vector<8x32xf32>
    %67 = arith.addf %23, %66 : vector<8x32xf32>
    %c0_28 = arith.constant 0 : index
    %c0_29 = arith.constant 0 : index
    %c0_30 = arith.constant 0 : index
    %68 = vector.load %arg8[%c0_28, %c0_29, %c0_30] : memref<2x1x32xf32, #tpu.memory_space<vmem>>, vector<1x1x32xf32>
    %69 = vector.shape_cast %68 : vector<1x1x32xf32> to vector<1x32xf32>
    %c0_31 = arith.constant 0 : index
    %c0_32 = arith.constant 0 : index
    %c0_33 = arith.constant 0 : index
    %70 = vector.load %arg9[%c0_31, %c0_32, %c0_33] : memref<2x1x32xf32, #tpu.memory_space<vmem>>, vector<1x1x32xf32>
    %71 = vector.shape_cast %70 : vector<1x1x32xf32> to vector<1x32xf32>
    %cst_34 = arith.constant dense<0.000000e+00> : vector<8xf32>
    %72 = vector.multi_reduction <add>, %67, %cst_34 [1] : vector<8x32xf32> to vector<8xf32>
    %73 = vector.shape_cast %72 : vector<8xf32> to vector<8x1xf32>
    %cst_35 = arith.constant 3.200000e+01 : f32
    %74 = vector.broadcast %cst_35 : f32 to vector<8x1xf32>
    %75 = arith.divf %73, %74 : vector<8x1xf32>
    %76 = vector.broadcast %75 : vector<8x1xf32> to vector<8x32xf32>
    %77 = arith.subf %67, %76 : vector<8x32xf32>
    %78 = arith.mulf %77, %77 : vector<8x32xf32>
    %cst_36 = arith.constant dense<0.000000e+00> : vector<8xf32>
    %79 = vector.multi_reduction <add>, %78, %cst_36 [1] : vector<8x32xf32> to vector<8xf32>
    %80 = vector.shape_cast %79 : vector<8xf32> to vector<8x1xf32>
    %cst_37 = arith.constant 3.200000e+01 : f32
    %81 = vector.broadcast %cst_37 : f32 to vector<8x1xf32>
    %82 = arith.divf %80, %81 : vector<8x1xf32>
    %cst_38 = arith.constant 9.99999996E-13 : f32
    %83 = vector.broadcast %cst_38 : f32 to vector<8x1xf32>
    %84 = arith.addf %82, %83 : vector<8x1xf32>
    %85 = math.rsqrt %84 : vector<8x1xf32>
    %86 = vector.broadcast %85 : vector<8x1xf32> to vector<8x32xf32>
    %87 = arith.mulf %77, %86 : vector<8x32xf32>
    %88 = vector.broadcast %69 : vector<1x32xf32> to vector<8x32xf32>
    %89 = arith.mulf %87, %88 : vector<8x32xf32>
    %90 = vector.broadcast %71 : vector<1x32xf32> to vector<8x32xf32>
    %91 = arith.addf %89, %90 : vector<8x32xf32>
    %92 = arith.truncf %91 : vector<8x32xf32> to vector<8x32xbf16>
    %c0_39 = arith.constant 0 : index
    %c0_40 = arith.constant 0 : index
    %c0_41 = arith.constant 0 : index
    %93 = vector.load %arg10[%c0_39, %c0_40, %c0_41] : memref<2x32x64xbf16, #tpu.memory_space<vmem>>, vector<1x32x64xbf16>
    %94 = vector.shape_cast %93 : vector<1x32x64xbf16> to vector<32x64xbf16>
    %cst_42 = arith.constant dense<0.000000e+00> : vector<8x64xf32>
    %95 = tpu.matmul %92, %94, %cst_42 {dimension_numbers = #tpu.dot_dimension_numbers<[1], [0], [0], [1], [0, 0, 1, 1], [], []>} : vector<8x32xbf16>, vector<32x64xbf16>, vector<8x64xf32> -> vector<8x64xf32>
    %c0_43 = arith.constant 0 : index
    %c0_44 = arith.constant 0 : index
    %c0_45 = arith.constant 0 : index
    %96 = vector.load %arg11[%c0_43, %c0_44, %c0_45] : memref<2x1x64xf32, #tpu.memory_space<vmem>>, vector<1x1x64xf32>
    %97 = vector.shape_cast %96 : vector<1x1x64xf32> to vector<1x64xf32>
    %98 = vector.broadcast %97 : vector<1x64xf32> to vector<8x64xf32>
    %99 = arith.addf %95, %98 : vector<8x64xf32>
    %cst_46 = arith.constant 5.000000e-01 : f32
    %100 = vector.broadcast %cst_46 : f32 to vector<8x64xf32>
    %101 = arith.mulf %100, %99 : vector<8x64xf32>
    %cst_47 = arith.constant 4.471500e-02 : f32
    %102 = vector.broadcast %cst_47 : f32 to vector<8x64xf32>
    %103 = arith.mulf %102, %99 : vector<8x64xf32>
    %104 = arith.mulf %103, %99 : vector<8x64xf32>
    %105 = arith.mulf %104, %99 : vector<8x64xf32>
    %106 = arith.addf %99, %105 : vector<8x64xf32>
    %cst_48 = arith.constant 0.797884583 : f32
    %107 = vector.broadcast %cst_48 : f32 to vector<8x64xf32>
    %108 = arith.mulf %107, %106 : vector<8x64xf32>
    %109 = math.tanh %108 : vector<8x64xf32>
    %cst_49 = arith.constant 1.000000e+00 : f32
    %110 = vector.broadcast %cst_49 : f32 to vector<8x64xf32>
    %111 = arith.addf %110, %109 : vector<8x64xf32>
    %112 = arith.mulf %101, %111 : vector<8x64xf32>
    %113 = arith.truncf %112 : vector<8x64xf32> to vector<8x64xbf16>
    %c0_50 = arith.constant 0 : index
    %c0_51 = arith.constant 0 : index
    %c0_52 = arith.constant 0 : index
    %114 = vector.load %arg12[%c0_50, %c0_51, %c0_52] : memref<2x64x32xbf16, #tpu.memory_space<vmem>>, vector<1x64x32xbf16>
    %115 = vector.shape_cast %114 : vector<1x64x32xbf16> to vector<64x32xbf16>
    %cst_53 = arith.constant dense<0.000000e+00> : vector<8x32xf32>
    %116 = tpu.matmul %113, %115, %cst_53 {dimension_numbers = #tpu.dot_dimension_numbers<[1], [0], [0], [1], [0, 0, 1, 1], [], []>} : vector<8x64xbf16>, vector<64x32xbf16>, vector<8x32xf32> -> vector<8x32xf32>
    %c0_54 = arith.constant 0 : index
    %c0_55 = arith.constant 0 : index
    %c0_56 = arith.constant 0 : index
    %117 = vector.load %arg13[%c0_54, %c0_55, %c0_56] : memref<2x1x32xf32, #tpu.memory_space<vmem>>, vector<1x1x32xf32>
    %118 = vector.shape_cast %117 : vector<1x1x32xf32> to vector<1x32xf32>
    %119 = vector.broadcast %118 : vector<1x32xf32> to vector<8x32xf32>
    %120 = arith.addf %116, %119 : vector<8x32xf32>
    %121 = arith.addf %91, %120 : vector<8x32xf32>
    %c0_57 = arith.constant 0 : index
    %c0_58 = arith.constant 0 : index
    %c0_59 = arith.constant 0 : index
    %122 = vector.load %arg14[%c0_57, %c0_58, %c0_59] : memref<2x1x32xf32, #tpu.memory_space<vmem>>, vector<1x1x32xf32>
    %123 = vector.shape_cast %122 : vector<1x1x32xf32> to vector<1x32xf32>
    %c0_60 = arith.constant 0 : index
    %c0_61 = arith.constant 0 : index
    %c0_62 = arith.constant 0 : index
    %124 = vector.load %arg15[%c0_60, %c0_61, %c0_62] : memref<2x1x32xf32, #tpu.memory_space<vmem>>, vector<1x1x32xf32>
    %125 = vector.shape_cast %124 : vector<1x1x32xf32> to vector<1x32xf32>
    %cst_63 = arith.constant dense<0.000000e+00> : vector<8xf32>
    %126 = vector.multi_reduction <add>, %121, %cst_63 [1] : vector<8x32xf32> to vector<8xf32>
    %127 = vector.shape_cast %126 : vector<8xf32> to vector<8x1xf32>
    %cst_64 = arith.constant 3.200000e+01 : f32
    %128 = vector.broadcast %cst_64 : f32 to vector<8x1xf32>
    %129 = arith.divf %127, %128 : vector<8x1xf32>
    %130 = vector.broadcast %129 : vector<8x1xf32> to vector<8x32xf32>
    %131 = arith.subf %121, %130 : vector<8x32xf32>
    %132 = arith.mulf %131, %131 : vector<8x32xf32>
    %cst_65 = arith.constant dense<0.000000e+00> : vector<8xf32>
    %133 = vector.multi_reduction <add>, %132, %cst_65 [1] : vector<8x32xf32> to vector<8xf32>
    %134 = vector.shape_cast %133 : vector<8xf32> to vector<8x1xf32>
    %cst_66 = arith.constant 3.200000e+01 : f32
    %135 = vector.broadcast %cst_66 : f32 to vector<8x1xf32>
    %136 = arith.divf %134, %135 : vector<8x1xf32>
    %cst_67 = arith.constant 9.99999996E-13 : f32
    %137 = vector.broadcast %cst_67 : f32 to vector<8x1xf32>
    %138 = arith.addf %136, %137 : vector<8x1xf32>
    %139 = math.rsqrt %138 : vector<8x1xf32>
    %140 = vector.broadcast %139 : vector<8x1xf32> to vector<8x32xf32>
    %141 = arith.mulf %131, %140 : vector<8x32xf32>
    %142 = vector.broadcast %123 : vector<1x32xf32> to vector<8x32xf32>
    %143 = arith.mulf %141, %142 : vector<8x32xf32>
    %144 = vector.broadcast %125 : vector<1x32xf32> to vector<8x32xf32>
    %145 = arith.addf %143, %144 : vector<8x32xf32>
    %146 = arith.truncf %145 : vector<8x32xf32> to vector<8x32xbf16>
    %c1 = arith.constant 1 : index
    %c0_68 = arith.constant 0 : index
    %c0_69 = arith.constant 0 : index
    %147 = vector.load %arg4[%c1, %c0_68, %c0_69] : memref<2x32x96xbf16, #tpu.memory_space<vmem>>, vector<1x32x96xbf16>
    %148 = vector.shape_cast %147 : vector<1x32x96xbf16> to vector<32x96xbf16>
    %cst_70 = arith.constant dense<0.000000e+00> : vector<8x96xf32>
    %149 = tpu.matmul %146, %148, %cst_70 {dimension_numbers = #tpu.dot_dimension_numbers<[1], [0], [0], [1], [0, 0, 1, 1], [], []>} : vector<8x32xbf16>, vector<32x96xbf16>, vector<8x96xf32> -> vector<8x96xf32>
    %c1_71 = arith.constant 1 : index
    %c0_72 = arith.constant 0 : index
    %c0_73 = arith.constant 0 : index
    %150 = vector.load %arg5[%c1_71, %c0_72, %c0_73] : memref<2x1x96xf32, #tpu.memory_space<vmem>>, vector<1x1x96xf32>
    %151 = vector.shape_cast %150 : vector<1x1x96xf32> to vector<1x96xf32>
    %152 = vector.broadcast %151 : vector<1x96xf32> to vector<8x96xf32>
    %153 = arith.addf %149, %152 : vector<8x96xf32>
    %154 = vector.extract_strided_slice %153 {offsets = [0, 0], sizes = [8, 32], strides = [1, 1]} : vector<8x96xf32> to vector<8x32xf32>
    %155 = vector.shape_cast %154 : vector<8x32xf32> to vector<8x4x8xf32>
    %156 = vector.extract_strided_slice %153 {offsets = [0, 32], sizes = [8, 32], strides = [1, 1]} : vector<8x96xf32> to vector<8x32xf32>
    %157 = vector.shape_cast %156 : vector<8x32xf32> to vector<8x4x8xf32>
    %158 = vector.extract_strided_slice %153 {offsets = [0, 64], sizes = [8, 32], strides = [1, 1]} : vector<8x96xf32> to vector<8x32xf32>
    %159 = vector.shape_cast %158 : vector<8x32xf32> to vector<8x4x8xf32>
    %160 = tpu.transpose %155, [1, 0, 2] : vector<8x4x8xf32> -> vector<4x8x8xf32>
    %161 = arith.truncf %160 : vector<4x8x8xf32> to vector<4x8x8xbf16>
    %162 = tpu.transpose %157, [1, 0, 2] : vector<8x4x8xf32> -> vector<4x8x8xf32>
    %163 = arith.truncf %162 : vector<4x8x8xf32> to vector<4x8x8xbf16>
    %164 = tpu.transpose %159, [1, 0, 2] : vector<8x4x8xf32> -> vector<4x8x8xf32>
    %165 = arith.truncf %164 : vector<4x8x8xf32> to vector<4x8x8xbf16>
    %cst_74 = arith.constant dense<0.000000e+00> : vector<4x8x8xf32>
    %166 = tpu.matmul %161, %163, %cst_74 {dimension_numbers = #tpu.dot_dimension_numbers<[2], [2], [1], [1], [0, 0, 0, 1, 1, 1], [0], [0]>} : vector<4x8x8xbf16>, vector<4x8x8xbf16>, vector<4x8x8xf32> -> vector<4x8x8xf32>
    %cst_75 = arith.constant dense<0xFF800000> : vector<4x8xf32>
    %167 = vector.multi_reduction <maximumf>, %166, %cst_75 [2] : vector<4x8x8xf32> to vector<4x8xf32>
    %168 = vector.shape_cast %167 : vector<4x8xf32> to vector<4x8x1xf32>
    %169 = vector.broadcast %168 : vector<4x8x1xf32> to vector<4x8x8xf32>
    %170 = arith.subf %166, %169 : vector<4x8x8xf32>
    %171 = math.exp %170 : vector<4x8x8xf32>
    %cst_76 = arith.constant dense<0.000000e+00> : vector<4x8xf32>
    %172 = vector.multi_reduction <add>, %171, %cst_76 [2] : vector<4x8x8xf32> to vector<4x8xf32>
    %173 = vector.shape_cast %172 : vector<4x8xf32> to vector<4x8x1xf32>
    %174 = tpu.reciprocal %173 {approx = true} : vector<4x8x1xf32> -> vector<4x8x1xf32>
    %175 = vector.broadcast %174 : vector<4x8x1xf32> to vector<4x8x8xf32>
    %176 = arith.mulf %171, %175 : vector<4x8x8xf32>
    %177 = arith.truncf %176 : vector<4x8x8xf32> to vector<4x8x8xbf16>
    %cst_77 = arith.constant dense<0.000000e+00> : vector<4x8x8xf32>
    %178 = tpu.matmul %177, %165, %cst_77 {dimension_numbers = #tpu.dot_dimension_numbers<[2], [1], [1], [2], [0, 0, 0, 1, 1, 2], [0], [0]>} : vector<4x8x8xbf16>, vector<4x8x8xbf16>, vector<4x8x8xf32> -> vector<4x8x8xf32>
    %179 = tpu.transpose %178, [1, 0, 2] : vector<4x8x8xf32> -> vector<8x4x8xf32>
    %180 = vector.shape_cast %179 : vector<8x4x8xf32> to vector<8x32xf32>
    %181 = arith.truncf %180 : vector<8x32xf32> to vector<8x32xbf16>
    %c1_78 = arith.constant 1 : index
    %c0_79 = arith.constant 0 : index
    %c0_80 = arith.constant 0 : index
    %182 = vector.load %arg6[%c1_78, %c0_79, %c0_80] : memref<2x32x32xbf16, #tpu.memory_space<vmem>>, vector<1x32x32xbf16>
    %183 = vector.shape_cast %182 : vector<1x32x32xbf16> to vector<32x32xbf16>
    %cst_81 = arith.constant dense<0.000000e+00> : vector<8x32xf32>
    %184 = tpu.matmul %181, %183, %cst_81 {dimension_numbers = #tpu.dot_dimension_numbers<[1], [0], [0], [1], [0, 0, 1, 1], [], []>} : vector<8x32xbf16>, vector<32x32xbf16>, vector<8x32xf32> -> vector<8x32xf32>
    %c1_82 = arith.constant 1 : index
    %c0_83 = arith.constant 0 : index
    %c0_84 = arith.constant 0 : index
    %185 = vector.load %arg7[%c1_82, %c0_83, %c0_84] : memref<2x1x32xf32, #tpu.memory_space<vmem>>, vector<1x1x32xf32>
    %186 = vector.shape_cast %185 : vector<1x1x32xf32> to vector<1x32xf32>
    %187 = vector.broadcast %186 : vector<1x32xf32> to vector<8x32xf32>
    %188 = arith.addf %184, %187 : vector<8x32xf32>
    %189 = arith.addf %145, %188 : vector<8x32xf32>
    %c1_85 = arith.constant 1 : index
    %c0_86 = arith.constant 0 : index
    %c0_87 = arith.constant 0 : index
    %190 = vector.load %arg8[%c1_85, %c0_86, %c0_87] : memref<2x1x32xf32, #tpu.memory_space<vmem>>, vector<1x1x32xf32>
    %191 = vector.shape_cast %190 : vector<1x1x32xf32> to vector<1x32xf32>
    %c1_88 = arith.constant 1 : index
    %c0_89 = arith.constant 0 : index
    %c0_90 = arith.constant 0 : index
    %192 = vector.load %arg9[%c1_88, %c0_89, %c0_90] : memref<2x1x32xf32, #tpu.memory_space<vmem>>, vector<1x1x32xf32>
    %193 = vector.shape_cast %192 : vector<1x1x32xf32> to vector<1x32xf32>
    %cst_91 = arith.constant dense<0.000000e+00> : vector<8xf32>
    %194 = vector.multi_reduction <add>, %189, %cst_91 [1] : vector<8x32xf32> to vector<8xf32>
    %195 = vector.shape_cast %194 : vector<8xf32> to vector<8x1xf32>
    %cst_92 = arith.constant 3.200000e+01 : f32
    %196 = vector.broadcast %cst_92 : f32 to vector<8x1xf32>
    %197 = arith.divf %195, %196 : vector<8x1xf32>
    %198 = vector.broadcast %197 : vector<8x1xf32> to vector<8x32xf32>
    %199 = arith.subf %189, %198 : vector<8x32xf32>
    %200 = arith.mulf %199, %199 : vector<8x32xf32>
    %cst_93 = arith.constant dense<0.000000e+00> : vector<8xf32>
    %201 = vector.multi_reduction <add>, %200, %cst_93 [1] : vector<8x32xf32> to vector<8xf32>
    %202 = vector.shape_cast %201 : vector<8xf32> to vector<8x1xf32>
    %cst_94 = arith.constant 3.200000e+01 : f32
    %203 = vector.broadcast %cst_94 : f32 to vector<8x1xf32>
    %204 = arith.divf %202, %203 : vector<8x1xf32>
    %cst_95 = arith.constant 9.99999996E-13 : f32
    %205 = vector.broadcast %cst_95 : f32 to vector<8x1xf32>
    %206 = arith.addf %204, %205 : vector<8x1xf32>
    %207 = math.rsqrt %206 : vector<8x1xf32>
    %208 = vector.broadcast %207 : vector<8x1xf32> to vector<8x32xf32>
    %209 = arith.mulf %199, %208 : vector<8x32xf32>
    %210 = vector.broadcast %191 : vector<1x32xf32> to vector<8x32xf32>
    %211 = arith.mulf %209, %210 : vector<8x32xf32>
    %212 = vector.broadcast %193 : vector<1x32xf32> to vector<8x32xf32>
    %213 = arith.addf %211, %212 : vector<8x32xf32>
    %214 = arith.truncf %213 : vector<8x32xf32> to vector<8x32xbf16>
    %c1_96 = arith.constant 1 : index
    %c0_97 = arith.constant 0 : index
    %c0_98 = arith.constant 0 : index
    %215 = vector.load %arg10[%c1_96, %c0_97, %c0_98] : memref<2x32x64xbf16, #tpu.memory_space<vmem>>, vector<1x32x64xbf16>
    %216 = vector.shape_cast %215 : vector<1x32x64xbf16> to vector<32x64xbf16>
    %cst_99 = arith.constant dense<0.000000e+00> : vector<8x64xf32>
    %217 = tpu.matmul %214, %216, %cst_99 {dimension_numbers = #tpu.dot_dimension_numbers<[1], [0], [0], [1], [0, 0, 1, 1], [], []>} : vector<8x32xbf16>, vector<32x64xbf16>, vector<8x64xf32> -> vector<8x64xf32>
    %c1_100 = arith.constant 1 : index
    %c0_101 = arith.constant 0 : index
    %c0_102 = arith.constant 0 : index
    %218 = vector.load %arg11[%c1_100, %c0_101, %c0_102] : memref<2x1x64xf32, #tpu.memory_space<vmem>>, vector<1x1x64xf32>
    %219 = vector.shape_cast %218 : vector<1x1x64xf32> to vector<1x64xf32>
    %220 = vector.broadcast %219 : vector<1x64xf32> to vector<8x64xf32>
    %221 = arith.addf %217, %220 : vector<8x64xf32>
    %cst_103 = arith.constant 5.000000e-01 : f32
    %222 = vector.broadcast %cst_103 : f32 to vector<8x64xf32>
    %223 = arith.mulf %222, %221 : vector<8x64xf32>
    %cst_104 = arith.constant 4.471500e-02 : f32
    %224 = vector.broadcast %cst_104 : f32 to vector<8x64xf32>
    %225 = arith.mulf %224, %221 : vector<8x64xf32>
    %226 = arith.mulf %225, %221 : vector<8x64xf32>
    %227 = arith.mulf %226, %221 : vector<8x64xf32>
    %228 = arith.addf %221, %227 : vector<8x64xf32>
    %cst_105 = arith.constant 0.797884583 : f32
    %229 = vector.broadcast %cst_105 : f32 to vector<8x64xf32>
    %230 = arith.mulf %229, %228 : vector<8x64xf32>
    %231 = math.tanh %230 : vector<8x64xf32>
    %cst_106 = arith.constant 1.000000e+00 : f32
    %232 = vector.broadcast %cst_106 : f32 to vector<8x64xf32>
    %233 = arith.addf %232, %231 : vector<8x64xf32>
    %234 = arith.mulf %223, %233 : vector<8x64xf32>
    %235 = arith.truncf %234 : vector<8x64xf32> to vector<8x64xbf16>
    %c1_107 = arith.constant 1 : index
    %c0_108 = arith.constant 0 : index
    %c0_109 = arith.constant 0 : index
    %236 = vector.load %arg12[%c1_107, %c0_108, %c0_109] : memref<2x64x32xbf16, #tpu.memory_space<vmem>>, vector<1x64x32xbf16>
    %237 = vector.shape_cast %236 : vector<1x64x32xbf16> to vector<64x32xbf16>
    %cst_110 = arith.constant dense<0.000000e+00> : vector<8x32xf32>
    %238 = tpu.matmul %235, %237, %cst_110 {dimension_numbers = #tpu.dot_dimension_numbers<[1], [0], [0], [1], [0, 0, 1, 1], [], []>} : vector<8x64xbf16>, vector<64x32xbf16>, vector<8x32xf32> -> vector<8x32xf32>
    %c1_111 = arith.constant 1 : index
    %c0_112 = arith.constant 0 : index
    %c0_113 = arith.constant 0 : index
    %239 = vector.load %arg13[%c1_111, %c0_112, %c0_113] : memref<2x1x32xf32, #tpu.memory_space<vmem>>, vector<1x1x32xf32>
    %240 = vector.shape_cast %239 : vector<1x1x32xf32> to vector<1x32xf32>
    %241 = vector.broadcast %240 : vector<1x32xf32> to vector<8x32xf32>
    %242 = arith.addf %238, %241 : vector<8x32xf32>
    %243 = arith.addf %213, %242 : vector<8x32xf32>
    %c1_114 = arith.constant 1 : index
    %c0_115 = arith.constant 0 : index
    %c0_116 = arith.constant 0 : index
    %244 = vector.load %arg14[%c1_114, %c0_115, %c0_116] : memref<2x1x32xf32, #tpu.memory_space<vmem>>, vector<1x1x32xf32>
    %245 = vector.shape_cast %244 : vector<1x1x32xf32> to vector<1x32xf32>
    %c1_117 = arith.constant 1 : index
    %c0_118 = arith.constant 0 : index
    %c0_119 = arith.constant 0 : index
    %246 = vector.load %arg15[%c1_117, %c0_118, %c0_119] : memref<2x1x32xf32, #tpu.memory_space<vmem>>, vector<1x1x32xf32>
    %247 = vector.shape_cast %246 : vector<1x1x32xf32> to vector<1x32xf32>
    %cst_120 = arith.constant dense<0.000000e+00> : vector<8xf32>
    %248 = vector.multi_reduction <add>, %243, %cst_120 [1] : vector<8x32xf32> to vector<8xf32>
    %249 = vector.shape_cast %248 : vector<8xf32> to vector<8x1xf32>
    %cst_121 = arith.constant 3.200000e+01 : f32
    %250 = vector.broadcast %cst_121 : f32 to vector<8x1xf32>
    %251 = arith.divf %249, %250 : vector<8x1xf32>
    %252 = vector.broadcast %251 : vector<8x1xf32> to vector<8x32xf32>
    %253 = arith.subf %243, %252 : vector<8x32xf32>
    %254 = arith.mulf %253, %253 : vector<8x32xf32>
    %cst_122 = arith.constant dense<0.000000e+00> : vector<8xf32>
    %255 = vector.multi_reduction <add>, %254, %cst_122 [1] : vector<8x32xf32> to vector<8xf32>
    %256 = vector.shape_cast %255 : vector<8xf32> to vector<8x1xf32>
    %cst_123 = arith.constant 3.200000e+01 : f32
    %257 = vector.broadcast %cst_123 : f32 to vector<8x1xf32>
    %258 = arith.divf %256, %257 : vector<8x1xf32>
    %cst_124 = arith.constant 9.99999996E-13 : f32
    %259 = vector.broadcast %cst_124 : f32 to vector<8x1xf32>
    %260 = arith.addf %258, %259 : vector<8x1xf32>
    %261 = math.rsqrt %260 : vector<8x1xf32>
    %262 = vector.broadcast %261 : vector<8x1xf32> to vector<8x32xf32>
    %263 = arith.mulf %253, %262 : vector<8x32xf32>
    %264 = vector.broadcast %245 : vector<1x32xf32> to vector<8x32xf32>
    %265 = arith.mulf %263, %264 : vector<8x32xf32>
    %266 = vector.broadcast %247 : vector<1x32xf32> to vector<8x32xf32>
    %267 = arith.addf %265, %266 : vector<8x32xf32>
    %c0_125 = arith.constant 0 : index
    %c0_126 = arith.constant 0 : index
    %c0_127 = arith.constant 0 : index
    %268 = vector.load %arg18[%c0_125, %c0_126, %c0_127] : memref<1x8x32xf32, #tpu.memory_space<vmem>>, vector<1x8x32xf32>
    %269 = vector.shape_cast %268 : vector<1x8x32xf32> to vector<8x32xf32>
    %270 = vector.shape_cast %267 : vector<8x32xf32> to vector<1x8x32xf32>
    tpu.vector_store %arg18[%c0_125, %c0_126, %c0_127], %270 {strides = array<i32>} : memref<1x8x32xf32, #tpu.memory_space<vmem>>, vector<1x8x32xf32>,
    %271 = vector.extract_strided_slice %267 {offsets = [0, 0], sizes = [1, 32], strides = [1, 1]} : vector<8x32xf32> to vector<1x32xf32>
    %272 = arith.truncf %271 : vector<1x32xf32> to vector<1x32xbf16>
    %c0_128 = arith.constant 0 : index
    %c0_129 = arith.constant 0 : index
    %273 = vector.load %arg16[%c0_128, %c0_129] : memref<32x32xbf16, #tpu.memory_space<vmem>>, vector<32x32xbf16>
    %cst_130 = arith.constant dense<0.000000e+00> : vector<1x32xf32>
    %274 = tpu.matmul %272, %273, %cst_130 {dimension_numbers = #tpu.dot_dimension_numbers<[1], [0], [0], [1], [0, 0, 1, 1], [], []>} : vector<1x32xbf16>, vector<32x32xbf16>, vector<1x32xf32> -> vector<1x32xf32>
    %c0_131 = arith.constant 0 : index
    %c0_132 = arith.constant 0 : index
    %275 = vector.load %arg17[%c0_131, %c0_132] : memref<1x32xf32, #tpu.memory_space<vmem>>, vector<1x32xf32>
    %276 = arith.addf %274, %275 : vector<1x32xf32>
    %277 = math.tanh %276 : vector<1x32xf32>
    %c0_133 = arith.constant 0 : index
    %c0_134 = arith.constant 0 : index
    %c0_135 = arith.constant 0 : index
    %278 = vector.load %arg19[%c0_133, %c0_134, %c0_135] : memref<1x1x32xf32, #tpu.memory_space<vmem>>, vector<1x1x32xf32>
    %279 = vector.shape_cast %278 : vector<1x1x32xf32> to vector<1x32xf32>
    %280 = vector.shape_cast %277 : vector<1x32xf32> to vector<1x1x32xf32>
    tpu.vector_store %arg19[%c0_133, %c0_134, %c0_135], %280 {strides = array<i32>} : memref<1x1x32xf32, #tpu.memory_space<vmem>>, vector<1x1x32xf32>,
    return
  }
  func.func @transform_0(%arg0: i32) -> (i32, i32, i32) {
    %c0_i32 = arith.constant 0 : i32
    %c0_i32_0 = arith.constant 0 : i32
    %c0_i32_1 = arith.constant 0 : i32
    return %arg0, %c0_i32, %c0_i32_0 : i32, i32, i32
  }
  func.func @transform_1(%arg0: i32) -> (i32, i32) {
    %c0_i32 = arith.constant 0 : i32
    %c0_i32_0 = arith.constant 0 : i32
    %c0_i32_1 = arith.constant 0 : i32
    return %c0_i32, %c0_i32_0 : i32, i32
  }
  func.func @transform_2(%arg0: i32) -> (i32, i32) {
    %c0_i32 = arith.constant 0 : i32
    %c0_i32_0 = arith.constant 0 : i32
    %c0_i32_1 = arith.constant 0 : i32
    return %c0_i32, %c0_i32_0 : i32, i32
  }
  func.func @transform_3(%arg0: i32) -> (i32, i32, i32) {
    %c0_i32 = arith.constant 0 : i32
    %c0_i32_0 = arith.constant 0 : i32
    %c0_i32_1 = arith.constant 0 : i32
    %c0_i32_2 = arith.constant 0 : i32
    return %c0_i32, %c0_i32_0, %c0_i32_1 : i32, i32, i32
  }
  func.func @transform_4(%arg0: i32) -> (i32, i32, i32) {
    %c0_i32 = arith.constant 0 : i32
    %c0_i32_0 = arith.constant 0 : i32
    %c0_i32_1 = arith.constant 0 : i32
    %c0_i32_2 = arith.constant 0 : i32
    return %c0_i32, %c0_i32_0, %c0_i32_1 : i32, i32, i32
  }
  func.func @transform_5(%arg0: i32) -> (i32, i32, i32) {
    %c0_i32 = arith.constant 0 : i32
    %c0_i32_0 = arith.constant 0 : i32
    %c0_i32_1 = arith.constant 0 : i32
    %c0_i32_2 = arith.constant 0 : i32
    return %c0_i32, %c0_i32_0, %c0_i32_1 : i32, i32, i32
  }
  func.func @transform_6(%arg0: i32) -> (i32, i32, i32) {
    %c0_i32 = arith.constant 0 : i32
    %c0_i32_0 = arith.constant 0 : i32
    %c0_i32_1 = arith.constant 0 : i32
    %c0_i32_2 = arith.constant 0 : i32
    return %c0_i32, %c0_i32_0, %c0_i32_1 : i32, i32, i32
  }
  func.func @transform_7(%arg0: i32) -> (i32, i32, i32) {
    %c0_i32 = arith.constant 0 : i32
    %c0_i32_0 = arith.constant 0 : i32
    %c0_i32_1 = arith.constant 0 : i32
    %c0_i32_2 = arith.constant 0 : i32
    return %c0_i32, %c0_i32_0, %c0_i32_1 : i32, i32, i32
  }
  func.func @transform_8(%arg0: i32) -> (i32, i32, i32) {
    %c0_i32 = arith.constant 0 : i32
    %c0_i32_0 = arith.constant 0 : i32
    %c0_i32_1 = arith.constant 0 : i32
    %c0_i32_2 = arith.constant 0 : i32
    return %c0_i32, %c0_i32_0, %c0_i32_1 : i32, i32, i32
  }
  func.func @transform_9(%arg0: i32) -> (i32, i32, i32) {
    %c0_i32 = arith.constant 0 : i32
    %c0_i32_0 = arith.constant 0 : i32
    %c0_i32_1 = arith.constant 0 : i32
    %c0_i32_2 = arith.constant 0 : i32
    return %c0_i32, %c0_i32_0, %c0_i32_1 : i32, i32, i32
  }
  func.func @transform_10(%arg0: i32) -> (i32, i32, i32) {
    %c0_i32 = arith.constant 0 : i32
    %c0_i32_0 = arith.constant 0 : i32
    %c0_i32_1 = arith.constant 0 : i32
    %c0_i32_2 = arith.constant 0 : i32
    return %c0_i32, %c0_i32_0, %c0_i32_1 : i32, i32, i32
  }
  func.func @transform_11(%arg0: i32) -> (i32, i32, i32) {
    %c0_i32 = arith.constant 0 : i32
    %c0_i32_0 = arith.constant 0 : i32
    %c0_i32_1 = arith.constant 0 : i32
    %c0_i32_2 = arith.constant 0 : i32
    return %c0_i32, %c0_i32_0, %c0_i32_1 : i32, i32, i32
  }
  func.func @transform_12(%arg0: i32) -> (i32, i32, i32) {
    %c0_i32 = arith.constant 0 : i32
    %c0_i32_0 = arith.constant 0 : i32
    %c0_i32_1 = arith.constant 0 : i32
    %c0_i32_2 = arith.constant 0 : i32
    return %c0_i32, %c0_i32_0, %c0_i32_1 : i32, i32, i32
  }
  func.func @transform_13(%arg0: i32) -> (i32, i32, i32) {
    %c0_i32 = arith.constant 0 : i32
    %c0_i32_0 = arith.constant 0 : i32
    %c0_i32_1 = arith.constant 0 : i32
    %c0_i32_2 = arith.constant 0 : i32
    return %c0_i32, %c0_i32_0, %c0_i32_1 : i32, i32, i32
  }
  func.func @transform_14(%arg0: i32) -> (i32, i32, i32) {
    %c0_i32 = arith.constant 0 : i32
    %c0_i32_0 = arith.constant 0 : i32
    %c0_i32_1 = arith.constant 0 : i32
    %c0_i32_2 = arith.constant 0 : i32
    return %c0_i32, %c0_i32_0, %c0_i32_1 : i32, i32, i32
  }
  func.func @transform_15(%arg0: i32) -> (i32, i32) {
    %c0_i32 = arith.constant 0 : i32
    %c0_i32_0 = arith.constant 0 : i32
    %c0_i32_1 = arith.constant 0 : i32
    return %c0_i32, %c0_i32_0 : i32, i32
  }
  func.func @transform_16(%arg0: i32) -> (i32, i32) {
    %c0_i32 = arith.constant 0 : i32
    %c0_i32_0 = arith.constant 0 : i32
    %c0_i32_1 = arith.constant 0 : i32
    return %c0_i32, %c0_i32_0 : i32, i32
  }
  func.func @transform_17(%arg0: i32) -> (i32, i32, i32) {
    %c0_i32 = arith.constant 0 : i32
    %c0_i32_0 = arith.constant 0 : i32
    %c0_i32_1 = arith.constant 0 : i32
    return %arg0, %c0_i32, %c0_i32_0 : i32, i32, i32
  }
  func.func @transform_18(%arg0: i32) -> (i32, i32, i32) {
    %c0_i32 = arith.constant 0 : i32
    %c0_i32_0 = arith.constant 0 : i32
    %c0_i32_1 = arith.constant 0 : i32
    return %arg0, %c0_i32, %c0_i32_0 : i32, i32, i32
  }
}

</mosaic_0001>

<bundles_post_ra>
// kernel: tpu_custom_call.1
= control target key start
LH: loop header
LB: loop body
LE: loop exit
PB: predicated region body
PF: predicated region fallthrough
CT: control target
= control target key end

     0   :  { %s4359_s0 = inlined_call_operand.hbm [shape: f32[2,8,32], index: 0, kind: input, shape index: {}]   ;;  %s4360_s1 = inlined_call_operand.hbm [shape: f32[1,32], index: 1, kind: input, shape index: {}]   ;;  %s4361_s2 = inlined_call_operand.vmem [shape: f32[1,32], index: 2, kind: input, shape index: {}]   ;;  %s4362_s3 = inlined_call_operand.vmem [shape: bf16[2,32,96], index: 3, kind: input, shape index: {}]   ;;  %s4363_s4 = inlined_call_operand.vmem [shape: f32[2,1,96], index: 4, kind: input, shape index: {}]   ;;  %s4364_s5 = inlined_call_operand.vmem [shape: bf16[2,32,32], index: 5, kind: input, shape index: {}]   ;;  %s4365_s6 = inlined_call_operand.vmem [shape: f32[2,1,32], index: 6, kind: input, shape index: {}]   ;;  %s4366_s7 = inlined_call_operand.hbm [shape: f32[2,1,32], index: 7, kind: input, shape index: {}]   ;;  %s4367_s8 = inlined_call_operand.vmem [shape: f32[2,1,32], index: 8, kind: input, shape index: {}]   ;;  %s4368_s9 = inlined_call_operand.vmem [shape: bf16[2,32,64], index: 9, kind: input, shape index: {}]   ;;  %s4369_s10 = inlined_call_operand.vmem [shape: f32[2,1,64], index: 10, kind: input, shape index: {}]   ;;  %s4370_s11 = inlined_call_operand.vmem [shape: bf16[2,64,32], index: 11, kind: input, shape index: {}]   ;;  %s4371_s12 = inlined_call_operand.vmem [shape: f32[2,1,32], index: 12, kind: input, shape index: {}]   ;;  %s4372_s13 = inlined_call_operand.hbm [shape: f32[2,1,32], index: 13, kind: input, shape index: {}]   ;;  %s4373_s14 = inlined_call_operand.vmem [shape: f32[2,1,32], index: 14, kind: input, shape index: {}]   ;;  %s4374_s15 = inlined_call_operand.hbm [shape: bf16[32,32], index: 15, kind: input, shape index: {}]   ;;  %s4375_s16 = inlined_call_operand.vmem [shape: f32[1,32], index: 16, kind: input, shape index: {}]   ;;  %s4376_s17 = inlined_call_operand.hbm [shape: f32[2,8,32], index: 17, kind: output, shape index: {0}]   ;;  %s4377_s18 = inlined_call_operand.hbm [shape: f32[2,1,32], index: 18, kind: output, shape index: {1}]  }
   0x1   :  { %4390 = sst [smem:[#allocation24_spill]] %s4359_s0 }
   0x2   :  { %4391 = sst [smem:[#allocation25_spill]] %s4360_s1 }
   0x3   :  { %4392 = sst [smem:[#allocation26_spill]] %s4361_s2 }
   0x4   :  { %4393 = sst [smem:[#allocation27_spill]] %s4362_s3 }
   0x5   :  { %4394 = sst [smem:[#allocation28_spill]] %s4363_s4 }
   0x6   :  { %4395 = sst [smem:[#allocation29_spill]] %s4366_s7 }
   0x7   :  { %4396 = sst [smem:[#allocation30_spill]] %s4372_s13 }
   0x8   :  { %4397 = sst [smem:[#allocation31_spill]] %s4374_s15 }
   0x9   :  { %4398 = sst [smem:[#allocation32_spill]] %s4375_s16 }
   0xa   :  { %4399 = sst [smem:[#allocation33_spill]] %s4376_s17 }
   0xb   :  { %4400 = sst [smem:[#allocation34_spill]] %s4377_s18 }
   0xc   :  { %24 = vsyncpa [#allocation3], 0 }
   0xd   :  { %26 = vsyncpa [#allocation3 + $0x1], 0 }
   0xe   :  { %27 = vsyncpa [#allocation6], 0 }
   0xf   :  { %28 = vsyncpa [#allocation9], 0 }
  0x10   :  { %29 = vsyncpa [#allocation4], 0 }
  0x11   :  { %31 = vsyncpa [#allocation4 + $0x1], 0 }
  0x12   :  { %32 = vsyncpa [#allocation13], 0 }
  0x13   :  { %34 = vsyncpa [#allocation13 + $0x1], 0  ;;  %s3582_s27 = smov 0   ;;  %s3584_s28 = smov 0  }
  0x14   :  { %s3586_s29 = smov 0   ;;  %s3588_s30 = smov 0  }
  0x15 LB: > { %4401 = sst [smem:[#allocation19_spill]] %s3454_s27  ;;  %s3606_s21 = sadd.s32 4294967295, %s3466_s30   ;;  %s3466_s30 = sphi %s3588_s30, %s4432_s30   ;;  %s3462_s29 = sphi %s3586_s29, %s4434_s29   ;;  %s3458_s28 = sphi %s3584_s28, %s4436_s28   ;;  %s3454_s27 = sphi %s3582_s27, %s4435_s27  }
  0x16   : > { %4402 = sst [smem:[#allocation20_spill]] %s3462_s29  ;;  %p2815_p0 = scmp.ge.s32.totalorder %s3466_s30, 1 }
  0x17   : > { %s4403_s1 = sld [smem:[#allocation25_spill]]  ;;  %p61_p1 = scmp.eq.s32.totalorder %s3606_s21, 0 }
  0x18   : > { %p459_p2 = scmp.lt.s32.totalorder %s3466_s30, 3  ;;  %s3468_s2 = smov [#allocation5]  }
  0x19   : > { %s473_s23 = sshll.u32 %s3468_s2, 4  ;;  %s4405_s13 = sld [smem:[#allocation30_spill]]  ;;  %s474_s23 = int_to_ptr.vmem [resolvable:$true] %s473_s23 }
  0x1a   : > { %p3611_p3 = pnand %p2815_p0, %p459_p2  ;;  %s4407_s7 = sld [smem:[#allocation29_spill]] }
  0x1b   : > { %s3469_s18 = smov [#allocation8]   ;;  %s3470_s24 = smov 16  }
  0x1c   : > { %p3017_p5 = pneg %p3611_p3  ;;  %s528_s16 = sshll.u32 %s3469_s18, 4  ;;  %s529_s16 = int_to_ptr.vmem [resolvable:$true] %s528_s16 }
  0x1d   : > { %s471_s20 = sshll.u32 %s4403_s1, 4  ;;  %s3471_s25 = smov 1   ;;  %s472_s20 = int_to_ptr.hbm [resolvable:$true] %s471_s20 }
  0x1e   : > { %p3623_p6 = pnand %p3017_p5, %p61_p1  ;;  %s4408_s15 = sld [smem:[#allocation31_spill]] }
  0x1f   : > { %s526_s26 = sshll.u32 %s4405_s13, 4  ;;  %s3472_s1 = smov [#allocation7]   ;;  %s527_s26 = int_to_ptr.hbm [resolvable:$true] %s526_s26 }
  0x20   : > { %s497_s2 = sshll.u32 %s4407_s7, 4  ;;  %s499_s18 = sshll.u32 %s3472_s1, 4  ;;  %s498_s2 = int_to_ptr.hbm [resolvable:$true] %s497_s2  ;;  %s500_s18 = int_to_ptr.vmem [resolvable:$true] %s499_s18 }
  0x21   : > { %3020 = dma.hbm_to_vmem [thread:$0]  (!%p3623_p6), %s472_s20, 16, %s474_s23, [#allocation6]  }
  0x22   : > { %3026 = dma.hbm_to_vmem [thread:$0]  (!%p3623_p6), %s527_s26, 32, %s529_s16, [#allocation9], %s3470_s24, %s3470_s24, %s3471_s25  }
  0x23   : > { %3023 = dma.hbm_to_vmem [thread:$0]  (!%p3623_p6), %s498_s2, 32, %s500_s18, [#allocation6], %s3470_s24, %s3470_s24, %s3471_s25  }
  0x24   : > { %s543_s19 = sshll.u32 %s4408_s15, 4  ;;  %s3473_s20 = smov [#allocation10]   ;;  %s544_s19 = int_to_ptr.hbm [resolvable:$true] %s543_s19 }
  0x25   : > { %s545_s16 = sshll.u32 %s3473_s20, 4  ;;  %s3474_s13 = smov 64   ;;  %s546_s16 = int_to_ptr.vmem [resolvable:$true] %s545_s16 }
  0x26   : > { %s3475_s17 = smov 4   ;;  %s2814_s23 = sadd.s32 4294967294, %s3466_s30  }
  0x27   : > { %3029 = dma.hbm_to_vmem [thread:$0]  (!%p3623_p6), %s544_s19, 256, %s546_s16, [#allocation9], %s3474_s13, %s3474_s13, %s3475_s17  }
  0x28   : > { %s3643_s26 = sadd.s32 1, %s3466_s30   ;;  %s47_s7 = sadd.s32 1, %s3462_s29 }
  0x29   : > { %4409 = sst [smem:[#allocation21_spill]] %s3643_s26  ;;  %s44_s1 = ssub.s32 %s3466_s30, %s3643_s26 }
  0x2a   : > { %p45_p7 = scmp.eq.s32.totalorder %s44_s1, 0  ;;  %p54_p8 = scmp.ne.s32.totalorder %s3462_s29, %s3458_s28 }
  0x2b   : > { %p55_p9 = scmp.eq.s32.totalorder %s3466_s30, 0  ;;  %p60_p10 = scmp.ne.s32.totalorder %s3458_s28, %s3454_s27 }
  0x2c   : > { %s3654_s2 = scalar_select %p45_p7, %s3462_s29, %s47_s7  }
  0x2d   : > { %p3656_p11 = por %p55_p9, %p54_p8  ;;  %p3662_p12 = por %p61_p1, %p60_p10 }
  0x2e   : > { %4410 = sst [smem:[#allocation22_spill]] %s3654_s2  ;;  %p420_p13 = scmp.eq.s32.totalorder %s3606_s21, 1 }
  0x2f   : > { %p426_p0 = scmp.eq.s32.totalorder %s2814_s23, 1  ;;  %p3045_p2 = scmp.lt.s32.totalorder %s3466_s30, 2 }
  0x30   : > { %s562_s25 = sand.u32 1, %s3462_s29   ;;  %p3669_p5 = por %p420_p13, %p54_p8 }
  0x31   : > { %p3673_p6 = por %p426_p0, %p60_p10  ;;  %s2821_s18 = sshll.u32 %s562_s25, 3 }
  0x32   : > { %s2822_s20 = sshll.u32 %s3466_s30, 3  ;;  %s4416_s17 = sld [smem:[#allocation24_spill]] }
  0x33   : > { %s4414_s7 = scalar_select %p3673_p6, 1, 0 }
  0x34   : > { %s566_s15 = scalar_lea.vmem [#allocation2], %s2821_s18  ;;  %p3683_p7 = pnand %p3045_p2, %p3656_p11 }
  0x35   : > { %4415 = sst [smem:[#allocation23_spill]] %s4414_s7  ;;  %s574_s2 = sshll.u32 %s566_s15, 4  ;;  %s575_s2 = int_to_ptr.vmem [resolvable:$true] %s574_s2 }
  0x36   : > { %s563_s29 = scalar_lea.sflag [#allocation3], %s562_s25  ;;  %p3334_p9 = pneg %p3683_p7 }
  0x38   : > { %s570_s1 = scalar_lea.hbm %s4416_s17, %s2822_s20  ;;  %s3337_s20 = scalar_lea.hbm %s4416_s17, 16 }
  0x39   : > { %s572_s26 = sshll.u32 %s570_s1, 4  ;;  %s573_s26 = int_to_ptr.hbm [resolvable:$true] %s572_s26 }
  0x3a   : > { %s3330_s27 = sshra.s32 %s573_s26, 4  ;;  %s3331_s27 = int_to_ptr.hbm [resolvable:$true] %s3330_s27 }
  0x3b   : > { %s3332_s7 = scalar_lea.hbm %s3331_s27, 8  ;;  %p3338_p11 = scmp.lt.s32.totalorder %s3331_s27, %s4416_s17 }
  0x3c   : > { %p3333_p8 = scmp.ne.s32.totalorder %s3331_s27, %s3332_s7  ;;  %p3339_p0 = scmp.lt.s32.totalorder %s3337_s20, %s3332_s7 }
  0x3e   : > { %p3335_p10 = pnand %p3334_p9, %p3333_p8  ;;  %p3340_p2 = por %p3339_p0, %p3338_p11 }
  0x40   : > { %p3336_p13 = pneg %p3335_p10 }
  0x42   : > { %p3341_p4 = pnand %p3340_p2, %p3336_p13 }
  0x44   : > { %3344 = shalt.err (!%p3341_p4)
}
  0x45   : > { %3033 = dma.hbm_to_vmem [thread:$0]  (!%p3683_p7), %s573_s26, 128, %s575_s2, %s563_s29  }
  0x46   : > { %583 = sbr.rel (%p3611_p3) target bundleno = 4532 (0x11b4), region = 88  ;;  %s3700_s25 = sand.u32 (!%p3611_p3), 1, %s3458_s28  }
  0x47   : > { %s4386_s13 = sshll.u32 (!%p3611_p3), %s3700_s25, 3  ;;  %s586_s1 = scalar_lea.sflag (!%p3611_p3), [#allocation3], %s3700_s25 }
  0x48   : > { %s589_s27 = scalar_lea.vmem (!%p3611_p3), [#allocation2], %s4386_s13 }
  0x4b   : > { %3433 = dma.done.wait (%p3662_p12), %s586_s1, 128  }
  0x4c   : > { %3435 = vsyncadd (%p3662_p12), %s586_s1, 4294967168 }
  0x4d   : > { %3437 = dma.done.wait (%p61_p1), [#allocation6], 48  }
  0x4e   : > { %3439 = vsyncadd (%p61_p1), [#allocation6], 4294967248 }
  0x4f   : > { %3441 = dma.done.wait (%p61_p1), [#allocation9], 288  }
  0x50   : > { %3443 = vsyncadd (%p61_p1), [#allocation9], 4294967008  ;;  %vm671_vm0 = vcmask 261120   ;;  %v668_v0 = vld [vmem:[%s589_s27] sm:$0xff]  ;;  %v3476_v2 = vmov 32.0   ;;  %s4418_s3 = sld [smem:[#allocation27_spill]] }
  0x51   : > { %v672_v1 = vsel %vm671_vm0, %v668_v0, 0.0  ;;  %3160 = vrcp.f32 %v3476_v2  ;;  %v3142_v25 = vld [vmem:[#allocation5] ss:$0 sm:$0xff]  ;;  %s4419_s23 = sld [smem:[#allocation26_spill]]  ;;  %s3477_s20 = smov 104   ;;  %vm757_vm5 = vcmask 1047556  }
  0x52   : > { %673 = vadd.xlane.f32.xlu0 %v672_v1  ;;  %s4420_s4 = sld [smem:[#allocation28_spill]]  ;;  %s3478_s16 = smov 120   ;;  %v3481_v42 = vmov 1983009808   ;;  %v3482_v56 = vmov 1934713408  }
  0x53   : > { %s3479_s24 = smov 112   ;;  %s3480_s1 = smov 96   ;;  %v762_v43 = vunpack.c.l.s4 %v3481_v42  ;;  %v786_v57 = vunpack.c.l.s4 %v3482_v56  ;;  %vm1123_vm6 = vcmask 64512   ;;  %vm1251_vm7 = vcmask 1043456  }
  0x54   : > { %s3483_s27 = smov 64   ;;  %s4388_s29 = smov 8   ;;  %vm1448_vm8 = vcmask 130048   ;;  %vm1450_vm9 = vcmask 195584   ;;  %vm1605_vm13 = vcmask 523264  }
  0x55   : > { %v3754_v47 = vunpack.c.0.s8 %v762_v43  ;;  %v3764_v62 = vunpack.c.0.s8 %v786_v57  ;;  %s4389_s22 = smov 16   ;;  %s4387_s26 = smov 24  }
  0x56   : > { %v2974_v14 = vld [vmem:[%s4418_s3 + $0x8] sm:$0xff]  ;;  %v2973_v15 = vld [vmem:[%s4418_s3] sm:$0xff]  ;;  %s4424_s15 = sshll.u32 %s3700_s25, 3  ;;  %s2646_s2 = scalar_lea.sflag [#allocation4], %s3700_s25 }
  0x57   : > { %v3161_v3 = vpop.eup %3160  ;;  %739 = vmatpush.bf16.msra.mxu0 %v2974_v14  ;;  %v3143_v28 = vld [vmem:[%s4419_s23] ss:$0 sm:$0xff] }
  0x58   : > { %v676_v4 = vmul.f32 32.0, %v3161_v3  ;;  %vm680_vm1 = vweird.f32 %v3161_v3  ;;  %v3144_v32 = vld [vmem:[%s4420_s4] ss:$0 sm:$0xff] }
  0x5a   : > { %v677_v5 = vsub.f32 1.0, %v676_v4 }
  0x5b   : > { %740 = vmatpush.bf16.msra.mxu0 %v2973_v15 }
  0x5c   : > { %v678_v6 = vmul.f32 %v3161_v3, %v677_v5 }
  0x5e   : > { %v679_v7 = vadd.f32 %v3161_v3, %v678_v6 }
  0x60   : > { %v3719_v8 = vsel %vm680_vm1, %v3161_v3, %v679_v7 }
  0xc5   : > { %v674_v9 = vpop.xlane.xlu0 %673 }
  0xc6   : > { %v682_v10 = vmul.f32 %v3719_v8, %v674_v9 }
  0xc8   : > { %v683_v11 = vsub.f32 %v668_v0, %v682_v10 }
  0xca   : > { %v684_v12 = vmul.f32 %v683_v11, %v683_v11 }
  0xcc   : > { %v685_v13 = vsel %vm671_vm0, %v684_v12, 0.0 }
  0xcd   : > { %686 = vadd.xlane.f32.xlu0 %v685_v13 }
 0x140   : > { %v687_v16 = vpop.xlane.xlu0 %686 }
 0x141   : > { %v688_v17 = vmul.f32 %v687_v16, %v3719_v8 }
 0x143   : > { %v689_v18 = vadd.f32 1e-12, %v688_v17 }
 0x145   : > { %3162 = vrsqrt.f32 %v689_v18  ;;  %vm696_vm3 = vweird.f32 %v689_v18 }
 0x14b   : > { %v3163_v19 = vpop.eup %3162 }
 0x14c   : > { %v691_v20 = vmul.f32 %v3163_v19, %v689_v18  ;;  %vm697_vm2 = vweird.f32 %v3163_v19 }
 0x14d   : > { %vm698_vm4 = vmor %vm696_vm3, %vm697_vm2 }
 0x14e   : > { %v692_v21 = vmul.f32 %v3163_v19, %v691_v20 }
 0x150   : > { %v693_v22 = vmul.f32 0.5, %v692_v21 }
 0x152   : > { %v694_v23 = vsub.f32 1.5, %v693_v22 }
 0x154   : > { %v695_v24 = vmul.f32 %v3163_v19, %v694_v23 }
 0x156   : > { %v699_v26 = vsel %vm698_vm4, %v3163_v19, %v695_v24 }
 0x157   : > { %v700_v27 = vmul.f32 %v699_v26, %v683_v11 }
 0x159   : > { %v704_v29 = vmul.f32 %v3142_v25, %v700_v27 }
 0x15b   : > { %v3733_v30 = vadd.f32 %v3143_v28, %v704_v29 }
 0x15d   : > { %v709_v31 = vpack.c.bf16 %v3733_v30, %v3733_v30 }
 0x15f   : > { %2838 = vmatmul.msk.bf16.vlgmr.msra.gmra.mxu0 %vm671_vm0, %v709_v31 }
 0x1dc   : > { %v742_v33 = vpop.f32.mrf.mxu0 }
 0x1dd   : > { %v743_v34 = vadd.f32 %v3144_v32, %v742_v33 }
 0x1df   : > { %753 = vrot.lane.b32.xlu2 %v743_v34, %s3477_s20  ;;  %747 = vrot.lane.b32.xlu1 %v743_v34, %s3478_s16  ;;  %v759_v44 = vrot.slane %v743_v34, 4 }
 0x1e4   : > { %v744_v35 = vpop.f32.mrf.mxu0 }
 0x1e7   : > { %750 = vrot.lane.b32.xlu1 %v743_v34, %s3479_s24 }
 0x239   : > { %v754_v38 = vpop.permute.xlu2 %753 }
 0x23a   : > { %v769_v51 = vrot.slane %v754_v38, 4 }
 0x251   : > { %v748_v36 = vpop.permute.xlu1 %747 }
 0x252   : > { %v3744_v37 = vpack.i.bf16 %v748_v36, %v743_v34  ;;  %v771_v48 = vrot.slane %v748_v36, 4  ;;  %v770_v52 = vsel %vm757_vm5, %v769_v51, %v748_v36 }
 0x253   : > { %v776_v58 = vperm.slane %v770_v52, %v3754_v47 }
 0x254   : > { %3103 = vrot.lane.b32.xlu2 %v3744_v37, %s3480_s1  ;;  %v772_v53 = vsel %vm757_vm5, %v754_v38, %v771_v48 }
 0x255   : > { %v780_v59 = vperm.slane %v772_v53, %v3754_v47  ;;  %v781_v63 = vrot.slane %v776_v58, 4 }
 0x257   : > { %v793_v0 = vrot.slane %v780_v59, 4 }
 0x259   : > { %v751_v39 = vpop.permute.xlu1 %750 }
 0x25a   : > { %v3748_v40 = vpack.i.bf16 %v754_v38, %v751_v39  ;;  %v756_v41 = vrot.slane %v751_v39, 4  ;;  %v760_v46 = vsel %vm757_vm5, %v751_v39, %v759_v44 }
 0x25b   : > { %v768_v50 = vperm.slane %v760_v46, %v3754_v47 }
 0x25c   : > { %3108 = vrot.lane.b32.xlu0 %v3748_v40, %s3480_s1  ;;  %v758_v45 = vsel %vm757_vm5, %v756_v41, %v743_v34 }
 0x25d   : > { %v764_v49 = vperm.slane %v758_v45, %v3754_v47  ;;  %v795_v55 = vrot.slane %v768_v50, 4  ;;  %v794_v5 = vsel %vm757_vm5, %v793_v0, %v768_v50 }
 0x25e   : > { %v800_v10 = vperm.slane %v794_v5, %v3764_v62 }
 0x25f   : > { %v783_v54 = vrot.slane %v764_v49, 4  ;;  %v796_v61 = vsel %vm757_vm5, %v780_v59, %v795_v55  ;;  %v782_v4 = vsel %vm757_vm5, %v781_v63, %v764_v49 }
 0x260   : > { %v804_v2 = vperm.slane %v796_v61, %v3764_v62  ;;  %v788_v9 = vperm.slane %v782_v4, %v3764_v62  ;;  %v809_v19 = vrot.slane %v800_v10, 4 }
 0x261   : > { %v784_v60 = vsel %vm757_vm5, %v776_v58, %v783_v54 }
 0x262   : > { %v792_v1 = vperm.slane %v784_v60, %v3764_v62  ;;  %v811_v12 = vrot.slane %v804_v2, 4  ;;  %v805_v18 = vrot.slane %v788_v9, 4  ;;  %v810_v39 = vsel %vm757_vm5, 0.0, %v809_v19 }
 0x264   : > { %v807_v11 = vrot.slane %v792_v1, 4  ;;  %v812_v20 = vsel %vm757_vm5, 0.0, %v811_v12  ;;  %v960_v26 = vsel %vm757_vm5, %v811_v12, %v800_v10  ;;  %v806_v41 = vsel %vm757_vm5, 0.0, %v805_v18 }
 0x265   : > { %v965_v29 = vrot.slane %v812_v20, 4  ;;  %v964_v48 = vperm.slane %v960_v26, %v3754_v47 }
 0x266   : > { %v808_v21 = vsel %vm757_vm5, 0.0, %v807_v11  ;;  %v949_v42 = vsel %vm757_vm5, %v807_v11, %v788_v9 }
 0x267   : > { %v954_v33 = vrot.slane %v808_v21, 4  ;;  %v966_v51 = vsel %vm757_vm5, %v965_v29, %v810_v39  ;;  %v953_v54 = vperm.slane %v949_v42, %v3754_v47  ;;  %v985_v1 = vrot.slane %v964_v48, 4 }
 0x268   : > { %v970_v60 = vperm.slane %v966_v51, %v3754_v47 }
 0x269   : > { %v955_v55 = vsel %vm757_vm5, %v954_v33, %v806_v41  ;;  %v973_v5 = vrot.slane %v953_v54, 4 }
 0x26a   : > { %v959_v4 = vperm.slane %v955_v55, %v3754_v47  ;;  %v986_v21 = vsel %vm757_vm5, %v970_v60, %v985_v1 }
 0x26c   : > { %v974_v20 = vsel %vm757_vm5, %v959_v4, %v973_v5 }
 0x2ae   : > { %v3104_v3 = vpop.permute.xlu2 %3103 }
 0x2af   : > { %v3106_v6 = vunpack.i.h.bf16 %v3104_v3  ;;  %v3105_v7 = vunpack.i.l.bf16 %v3104_v3 }
 0x2b1   : > { %v839_v14 = vrot.slane %v3106_v6, 4  ;;  %v827_v15 = vrot.slane %v3105_v7, 4 }
 0x2ce   : > { %v3109_v13 = vpop.permute.xlu0 %3108 }
 0x2cf   : > { %v3111_v16 = vunpack.i.h.bf16 %v3109_v13  ;;  %v3110_v17 = vunpack.i.l.bf16 %v3109_v13 }
 0x2d1   : > { %v837_v22 = vrot.slane %v3111_v16, 4  ;;  %v840_v23 = vsel %vm757_vm5, %v3111_v16, %v839_v14  ;;  %v825_v24 = vrot.slane %v3110_v17, 4  ;;  %v828_v25 = vsel %vm757_vm5, %v3110_v17, %v827_v15 }
 0x2d2   : > { %v848_v27 = vperm.slane %v840_v23, %v3754_v47  ;;  %v836_v28 = vperm.slane %v828_v25, %v3754_v47  ;;  %v983_v14 = vrot.slane %v970_v60, 4  ;;  %v971_v25 = vrot.slane %v959_v4, 4 }
 0x2d3   : > { %v838_v31 = vsel %vm757_vm5, %v837_v22, %v3106_v6  ;;  %v826_v32 = vsel %vm757_vm5, %v825_v24, %v3105_v7 }
 0x2d4   : > { %v844_v34 = vperm.slane %v838_v31, %v3754_v47  ;;  %v861_v35 = vrot.slane %v848_v27, 4  ;;  %v832_v36 = vperm.slane %v826_v32, %v3754_v47  ;;  %v863_v38 = vrot.slane %v836_v28, 4 }
 0x2d5   : > { %v994_v32 = vperm.slane %v986_v21, %v3764_v62  ;;  %v972_v39 = vsel %vm757_vm5, %v971_v25, %v953_v54 }
 0x2d6   : > { %v849_v43 = vrot.slane %v844_v34, 4  ;;  %v851_v44 = vrot.slane %v832_v36, 4  ;;  %v862_v45 = vsel %vm757_vm5, %v861_v35, %v836_v28  ;;  %v864_v46 = vsel %vm757_vm5, %v848_v27, %v863_v38 }
 0x2d7   : > { %v868_v49 = vperm.slane %v862_v45, %v3764_v62  ;;  %v872_v50 = vperm.slane %v864_v46, %v3764_v62  ;;  %v984_v27 = vsel %vm757_vm5, %v983_v14, %v964_v48  ;;  %v999_v48 = vrot.slane %v994_v32, 4 }
 0x2d8   : > { %v850_v52 = vsel %vm757_vm5, %v849_v43, %v832_v36  ;;  %v852_v53 = vsel %vm757_vm5, %v844_v34, %v851_v44  ;;  %v982_v36 = vperm.slane %v974_v20, %v3764_v62  ;;  %v990_v41 = vperm.slane %v984_v27, %v3764_v62 }
 0x2d9   : > { %v856_v56 = vperm.slane %v850_v52, %v3764_v62  ;;  %v860_v57 = vperm.slane %v852_v53, %v3764_v62  ;;  %v877_v58 = vrot.slane %v868_v49, 4  ;;  %v879_v59 = vrot.slane %v872_v50, 4 }
 0x2da   : > { %v978_v52 = vperm.slane %v972_v39, %v3764_v62 }
 0x2db   : > { %v873_v61 = vrot.slane %v856_v56, 4  ;;  %v875_v63 = vrot.slane %v860_v57, 4  ;;  %v880_v0 = vsel %vm757_vm5, 0.0, %v879_v59  ;;  %v1018_v3 = vsel %vm757_vm5, %v879_v59, %v868_v49 }
 0x2dc   : > { %v1023_v2 = vrot.slane %v880_v0, 4  ;;  %v878_v7 = vsel %vm757_vm5, 0.0, %v877_v58  ;;  %v1022_v10 = vperm.slane %v1018_v3, %v3754_v47  ;;  %v1001_v57 = vrot.slane %v982_v36, 4 }
 0x2dd   : > { %v876_v6 = vsel %vm757_vm5, 0.0, %v875_v63  ;;  %v1007_v9 = vsel %vm757_vm5, %v875_v63, %v856_v56  ;;  %v874_v15 = vsel %vm757_vm5, 0.0, %v873_v61  ;;  %v995_v58 = vrot.slane %v990_v41, 4 }
 0x2de   : > { %v1011_v11 = vperm.slane %v1007_v9, %v3754_v47  ;;  %v1012_v12 = vrot.slane %v876_v6, 4  ;;  %v1024_v13 = vsel %vm757_vm5, %v1023_v2, %v878_v7  ;;  %v1043_v17 = vrot.slane %v1022_v10, 4 }
 0x2df   : > { %v1028_v16 = vperm.slane %v1024_v13, %v3754_v47  ;;  %v1000_v63 = vsel %vm757_vm5, %v999_v48, %v982_v36  ;;  %v997_v0 = vrot.slane %v978_v52, 4  ;;  %v996_v2 = vsel %vm757_vm5, %v995_v58, %v978_v52 }
 0x2e0   : > { %v1013_v18 = vsel %vm757_vm5, %v1012_v12, %v874_v15  ;;  %v1031_v19 = vrot.slane %v1011_v11, 4  ;;  %v1002_v3 = vsel %vm757_vm5, %v994_v32, %v1001_v57  ;;  %v1005_v4 = vpack.c.bf16 %v1000_v63, %v1000_v63 }
 0x2e1   : > { %v1017_v22 = vperm.slane %v1013_v18, %v3754_v47  ;;  %v1044_v23 = vsel %vm757_vm5, %v1028_v16, %v1043_v17  ;;  %v1041_v24 = vrot.slane %v1028_v16, 4  ;;  %v998_v5 = vsel %vm757_vm5, %v990_v41, %v997_v0 }
 0x2e2   : > { %v1052_v26 = vperm.slane %v1044_v23, %v3764_v62  ;;  %v1003_v6 = vpack.c.bf16 %v996_v2, %v996_v2  ;;  %v1006_v7 = vpack.c.bf16 %v1002_v3, %v1002_v3  ;;  %v1004_v9 = vpack.c.bf16 %v998_v5, %v998_v5 }
 0x2e3   : > { %v1032_v28 = vsel %vm757_vm5, %v1017_v22, %v1031_v19  ;;  %v1029_v29 = vrot.slane %v1017_v22, 4  ;;  %v1042_v31 = vsel %vm757_vm5, %v1041_v24, %v1022_v10 }
 0x2e4   : > { %v1040_v33 = vperm.slane %v1032_v28, %v3764_v62  ;;  %v1057_v34 = vrot.slane %v1052_v26, 4  ;;  %v1048_v35 = vperm.slane %v1042_v31, %v3764_v62 }
 0x2e5   : > { %v1030_v38 = vsel %vm757_vm5, %v1029_v29, %v1011_v11 }
 0x2e6   : > { %v1058_v42 = vsel %vm757_vm5, %v1057_v34, %v1040_v33  ;;  %v1036_v43 = vperm.slane %v1030_v38, %v3764_v62  ;;  %v1053_v44 = vrot.slane %v1048_v35, 4  ;;  %v1059_v45 = vrot.slane %v1040_v33, 4 }
 0x2e7   : > { %v1063_v46 = vpack.c.bf16 %v1058_v42, %v1058_v42 }
 0x2e8   : > { %v1054_v49 = vsel %vm757_vm5, %v1053_v44, %v1036_v43  ;;  %v1060_v50 = vsel %vm757_vm5, %v1052_v26, %v1059_v45  ;;  %v1055_v51 = vrot.slane %v1036_v43, 4 }
 0x2e9   : > { %v1166_v53 = vsel %vm1123_vm6, %v1063_v46, 0  ;;  %v1061_v54 = vpack.c.bf16 %v1054_v49, %v1054_v49  ;;  %v1064_v55 = vpack.c.bf16 %v1060_v50, %v1060_v50 }
 0x2ea   : > { %1175 = vmatpush.bf16.xpose.msra.mxu3 %v1166_v53  ;;  %v1056_v56 = vsel %vm757_vm5, %v1048_v35, %v1055_v51 }
 0x2eb   : > { %v1128_v59 = vsel %vm1123_vm6, %v1061_v54, 0  ;;  %v1185_v60 = vsel %vm1123_vm6, %v1064_v55, 0  ;;  %v1062_v61 = vpack.c.bf16 %v1056_v56, %v1056_v56 }
 0x2ec   : > { %1137 = vmatpush.bf16.xpose.msra.mxu1 %v1128_v59  ;;  %1194 = vmatpush.bf16.xpose.msrb.mxu0 %v1185_v60 }
 0x2ed   : > { %v1147_v1 = vsel %vm1123_vm6, %v1062_v61, 0 }
 0x2ee   : > { %1156 = vmatpush.bf16.xpose.msra.mxu2 %v1147_v1 }
 0x2f1   : > { %2841 = vmatmul.msk.bf16.vlgmr.msra.gmra.mxu3 %vm1123_vm6, %v1005_v4 }
 0x2f3   : > { %2839 = vmatmul.msk.bf16.vlgmr.msra.gmra.mxu1 %vm1123_vm6, %v1003_v6  ;;  %2842 = vmatmul.msk.bf16.vlgmr.msrb.gmra.mxu0 %vm1123_vm6, %v1006_v7 }
 0x2f5   : > { %2840 = vmatmul.msk.bf16.vlgmr.msra.gmra.mxu2 %vm1123_vm6, %v1004_v9 }
 0x370   : > { %v1139_v10 = vpop.f32.mrf.mxu1  ;;  %v1196_v11 = vpop.f32.mrf.mxu0 }
 0x371   : > { %v1209_v12 = vsel %vm1123_vm6, %v1196_v11, -inf  ;;  %v1200_v13 = vsel %vm1123_vm6, %v1139_v10, -inf }
 0x372   : > { %1210 = vmax.xlane.f32.xlu2 %v1209_v12  ;;  %1201 = vmax.xlane.f32.xlu0 %v1200_v13 }
 0x374   : > { %v1177_v14 = vpop.f32.mrf.mxu3 }
 0x375   : > { %v1206_v15 = vsel %vm1123_vm6, %v1177_v14, -inf }
 0x376   : > { %1207 = vmax.xlane.f32.xlu1 %v1206_v15 }
 0x378   : > { %v1141_v16 = vpop.f32.mrf.mxu1  ;;  %v1158_v17 = vpop.f32.mrf.mxu2 }
 0x379   : > { %v1198_v18 = vpop.f32.mrf.mxu0  ;;  %v1203_v19 = vsel %vm1123_vm6, %v1158_v17, -inf }
 0x37a   : > { %1204 = vmax.xlane.f32.xlu2 %v1203_v19 }
 0x37c   : > { %v1179_v20 = vpop.f32.mrf.mxu3 }
 0x380   : > { %v1160_v21 = vpop.f32.mrf.mxu2 }
 0x38f   : > { %3113 = vrot.lane.b32.xlu1 %v3744_v37, %s3483_s27 }
 0x392   : > { %3118 = vrot.lane.b32.xlu2 %v3748_v40, %s3483_s27 }
 0x3e5   : > { %v1211_v22 = vpop.xlane.xlu2 %1210  ;;  %v1202_v25 = vpop.xlane.xlu0 %1201 }
 0x3e6   : > { %v1215_v23 = vsub.f32 %v1196_v11, %v1211_v22  ;;  %v1212_v28 = vsub.f32 %v1139_v10, %v1202_v25 }
 0x3e8   : > { %v1222_v24 = vmul.f32 1.442695, %v1215_v23  ;;  %v1216_v34 = vmul.f32 1.442695, %v1212_v28 }
 0x3e9   : > { %v1208_v26 = vpop.xlane.xlu1 %1207 }
 0x3ea   : > { %3164 = vpow2.f32 %v1222_v24  ;;  %v1214_v27 = vsub.f32 %v1177_v14, %v1208_v26 }
 0x3ec   : > { %v1220_v29 = vmul.f32 1.442695, %v1214_v27 }
 0x3ed   : > { %v1205_v31 = vpop.xlane.xlu2 %1204 }
 0x3ee   : > { %3166 = vpow2.f32 %v1220_v29  ;;  %v1213_v32 = vsub.f32 %v1158_v17, %v1205_v31 }
 0x3f0   : > { %v3852_v33 = vpop.eup %3164  ;;  %v1218_v35 = vmul.f32 1.442695, %v1213_v32 }
 0x3f1   : > { %v1233_v37 = vsel %vm1123_vm6, %v3852_v33, 0.0 }
 0x3f2   : > { %3168 = vpow2.f32 %v1218_v35  ;;  %1234 = vadd.xlane.f32.xlu2 %v1233_v37 }
 0x3f3   : > { %3170 = vpow2.f32 %v1216_v34 }
 0x3f4   : > { %v3856_v40 = vpop.eup %3166 }
 0x3f5   : > { %v1230_v36 = vsel %vm1123_vm6, %v3856_v40, 0.0  ;;  %v3119_v42 = vpop.permute.xlu2 %3118 }
 0x3f6   : > { %1231 = vadd.xlane.f32.xlu0 %v1230_v36  ;;  %v3121_v44 = vunpack.i.h.bf16 %v3119_v42  ;;  %v3120_v45 = vunpack.i.l.bf16 %v3119_v42 }
 0x3f8   : > { %v3860_v38 = vpop.eup %3168  ;;  %v905_v48 = vrot.slane %v3121_v44, 4  ;;  %v893_v49 = vrot.slane %v3120_v45, 4 }
 0x3f9   : > { %v1227_v39 = vsel %vm1123_vm6, %v3860_v38, 0.0  ;;  %v3864_v41 = vpop.eup %3170 }
 0x3fa   : > { %1228 = vadd.xlane.f32.xlu1 %v1227_v39  ;;  %v1224_v43 = vsel %vm1123_vm6, %v3864_v41, 0.0 }
 0x3fe   : > { %1225 = vadd.xlane.f32.xlu0 %v1224_v43 }
 0x401   : > { %v3114_v46 = vpop.permute.xlu1 %3113 }
 0x402   : > { %v3116_v50 = vunpack.i.h.bf16 %v3114_v46  ;;  %v3115_v51 = vunpack.i.l.bf16 %v3114_v46 }
 0x404   : > { %v907_v52 = vrot.slane %v3116_v50, 4  ;;  %v894_v53 = vsel %vm757_vm5, %v893_v49, %v3115_v51  ;;  %v895_v54 = vrot.slane %v3115_v51, 4  ;;  %v906_v55 = vsel %vm757_vm5, %v905_v48, %v3116_v50 }
 0x405   : > { %v900_v56 = vperm.slane %v894_v53, %v3754_v47  ;;  %v912_v57 = vperm.slane %v906_v55, %v3754_v47 }
 0x406   : > { %v896_v58 = vsel %vm757_vm5, %v3120_v45, %v895_v54  ;;  %v908_v59 = vsel %vm757_vm5, %v3121_v44, %v907_v52 }
 0x407   : > { %v904_v60 = vperm.slane %v896_v58, %v3754_v47  ;;  %v916_v61 = vperm.slane %v908_v59, %v3754_v47  ;;  %v917_v63 = vrot.slane %v912_v57, 4  ;;  %v919_v0 = vrot.slane %v900_v56, 4 }
 0x409   : > { %v918_v1 = vsel %vm757_vm5, %v917_v63, %v900_v56  ;;  %v920_v2 = vsel %vm757_vm5, %v912_v57, %v919_v0  ;;  %v929_v3 = vrot.slane %v916_v61, 4  ;;  %v931_v4 = vrot.slane %v904_v60, 4 }
 0x40a   : > { %v924_v5 = vperm.slane %v918_v1, %v3764_v62  ;;  %v928_v6 = vperm.slane %v920_v2, %v3764_v62 }
 0x40b   : > { %v930_v7 = vsel %vm757_vm5, %v929_v3, %v904_v60  ;;  %v932_v9 = vsel %vm757_vm5, %v916_v61, %v931_v4 }
 0x40c   : > { %v936_v10 = vperm.slane %v930_v7, %v3764_v62  ;;  %v940_v11 = vperm.slane %v932_v9, %v3764_v62  ;;  %v941_v12 = vrot.slane %v924_v5, 4  ;;  %v943_v13 = vrot.slane %v928_v6, 4 }
 0x40e   : > { %v944_v14 = vsel %vm757_vm5, 0.0, %v943_v13  ;;  %v945_v15 = vrot.slane %v936_v10, 4  ;;  %v947_v16 = vrot.slane %v940_v11, 4  ;;  %v1065_v17 = vsel %vm757_vm5, %v943_v13, %v924_v5 }
 0x40f   : > { %v1070_v18 = vrot.slane %v944_v14, 4  ;;  %v942_v19 = vsel %vm757_vm5, 0.0, %v941_v12  ;;  %v1069_v21 = vperm.slane %v1065_v17, %v3754_v47 }
 0x410   : > { %v948_v20 = vsel %vm757_vm5, 0.0, %v947_v16  ;;  %v1076_v22 = vsel %vm757_vm5, %v947_v16, %v936_v10  ;;  %v946_v26 = vsel %vm757_vm5, 0.0, %v945_v15 }
 0x411   : > { %v1081_v23 = vrot.slane %v948_v20, 4  ;;  %v1071_v24 = vsel %vm757_vm5, %v1070_v18, %v942_v19  ;;  %v1080_v25 = vperm.slane %v1076_v22, %v3754_v47  ;;  %v1089_v28 = vrot.slane %v1069_v21, 4 }
 0x412   : > { %v1075_v27 = vperm.slane %v1071_v24, %v3754_v47 }
 0x413   : > { %v1082_v29 = vsel %vm757_vm5, %v1081_v23, %v946_v26  ;;  %v1101_v31 = vrot.slane %v1080_v25, 4 }
 0x414   : > { %v1086_v32 = vperm.slane %v1082_v29, %v3754_v47  ;;  %v1090_v34 = vsel %vm757_vm5, %v1075_v27, %v1089_v28  ;;  %v1087_v35 = vrot.slane %v1075_v27, 4 }
 0x415   : > { %v1098_v37 = vperm.slane %v1090_v34, %v3764_v62 }
 0x416   : > { %v1102_v36 = vsel %vm757_vm5, %v1086_v32, %v1101_v31  ;;  %v1088_v39 = vsel %vm757_vm5, %v1087_v35, %v1069_v21  ;;  %v1099_v42 = vrot.slane %v1086_v32, 4 }
 0x417   : > { %v1110_v43 = vperm.slane %v1102_v36, %v3764_v62  ;;  %v1117_v44 = vrot.slane %v1098_v37, 4  ;;  %v1094_v45 = vperm.slane %v1088_v39, %v3764_v62 }
 0x418   : > { %v1100_v46 = vsel %vm757_vm5, %v1099_v42, %v1080_v25 }
 0x419   : > { %v1118_v48 = vsel %vm757_vm5, %v1110_v43, %v1117_v44  ;;  %v1106_v49 = vperm.slane %v1100_v46, %v3764_v62  ;;  %v1113_v50 = vrot.slane %v1094_v45, 4  ;;  %v1115_v51 = vrot.slane %v1110_v43, 4 }
 0x41a   : > { %v1122_v52 = vpack.c.bf16 %v1118_v48, %v1118_v48 }
 0x41b   : > { %v1114_v53 = vsel %vm757_vm5, %v1106_v49, %v1113_v50  ;;  %v1116_v54 = vsel %vm757_vm5, %v1115_v51, %v1098_v37  ;;  %v1111_v55 = vrot.slane %v1106_v49, 4 }
 0x41c   : > { %v1310_v56 = vsel %vm1251_vm7, %v1122_v52, 0  ;;  %v1120_v57 = vpack.c.bf16 %v1114_v53, %v1114_v53  ;;  %v1121_v58 = vpack.c.bf16 %v1116_v54, %v1116_v54 }
 0x41d   : > { %1319 = vmatpush.bf16.msra.mxu0 %v1310_v56  ;;  %v1112_v59 = vsel %vm757_vm5, %v1111_v55, %v1094_v45 }
 0x41e   : > { %v1272_v60 = vsel %vm1251_vm7, %v1120_v57, 0  ;;  %v1291_v61 = vsel %vm1251_vm7, %v1121_v58, 0  ;;  %v1119_v63 = vpack.c.bf16 %v1112_v59, %v1112_v59 }
 0x41f   : > { %1281 = vmatpush.bf16.msrb.mxu2 %v1272_v60  ;;  %1300 = vmatpush.bf16.msrb.mxu3 %v1291_v61 }
 0x420   : > { %v1253_v0 = vsel %vm1251_vm7, %v1119_v63, 0 }
 0x421   : > { %1262 = vmatpush.bf16.msrb.mxu1 %v1253_v0 }
 0x465   : > { %v1235_v1 = vpop.xlane.xlu2 %1234 }
 0x466   : > { %3172 = vrcp.f32 %v1235_v1 }
 0x469   : > { %v1232_v2 = vpop.xlane.xlu0 %1231 }
 0x46a   : > { %3174 = vrcp.f32 %v1232_v2 }
 0x46c   : > { %v3173_v3 = vpop.eup %3172 }
 0x46d   : > { %v1243_v4 = vmul.f32 %v3173_v3, %v3852_v33  ;;  %v1229_v5 = vpop.xlane.xlu1 %1228 }
 0x46e   : > { %3176 = vrcp.f32 %v1229_v5 }
 0x46f   : > { %v1247_v6 = vpack.c.bf16 %v1243_v4, %v1243_v4 }
 0x470   : > { %v3175_v7 = vpop.eup %3174 }
 0x471   : > { %v1242_v9 = vmul.f32 %v3175_v7, %v3856_v40  ;;  %2846 = vmatmul.msk.bf16.vlgmr.msra.gmra.mxu0 %vm1123_vm6, %v1247_v6  ;;  %v1226_v10 = vpop.xlane.xlu0 %1225 }
 0x472   : > { %3178 = vrcp.f32 %v1226_v10 }
 0x473   : > { %v1246_v11 = vpack.c.bf16 %v1242_v9, %v1242_v9 }
 0x474   : > { %v3177_v12 = vpop.eup %3176 }
 0x475   : > { %v1241_v13 = vmul.f32 %v3177_v12, %v3860_v38  ;;  %2845 = vmatmul.msk.bf16.vlgmr.msrb.gmra.mxu3 %vm1123_vm6, %v1246_v11 }
 0x477   : > { %v1245_v14 = vpack.c.bf16 %v1241_v13, %v1241_v13 }
 0x478   : > { %v3179_v15 = vpop.eup %3178 }
 0x479   : > { %v1240_v33 = vmul.f32 %v3179_v15, %v3864_v41  ;;  %2844 = vmatmul.msk.bf16.vlgmr.msrb.gmra.mxu2 %vm1123_vm6, %v1245_v14 }
 0x47b   : > { %v1244_v16 = vpack.c.bf16 %v1240_v33, %v1240_v33 }
 0x47d   : > { %2843 = vmatmul.msk.bf16.vlgmr.msrb.gmra.mxu1 %vm1123_vm6, %v1244_v16 }
 0x4ee   : > { %v1321_v40 = vpop.f32.mrf.mxu0 }
 0x4ef   : > { %v1337_v21 = vrot.slane %v1321_v40, 4 }
 0x4f6   : > { %v1323_v17 = vpop.f32.mrf.mxu0 }
 0x4f8   : > { %v1302_v18 = vpop.f32.mrf.mxu3 }
 0x4f9   : > { %v1325_v19 = vrot.slane %v1302_v18, 4 }
 0x4fa   : > { %v1264_v20 = vpop.f32.mrf.mxu1 }
 0x4fb   : > { %v1326_v22 = vsel %vm757_vm5, %v1325_v19, %v1264_v20  ;;  %v1327_v38 = vrot.slane %v1264_v20, 4 }
 0x4fc   : > { %v1332_v23 = vperm.slane %v1326_v22, %v3754_v47  ;;  %v1283_v24 = vpop.f32.mrf.mxu2 }
 0x4fd   : > { %v1328_v25 = vsel %vm757_vm5, %v1302_v18, %v1327_v38  ;;  %v1338_v41 = vsel %vm757_vm5, %v1337_v21, %v1283_v24  ;;  %v1339_v26 = vrot.slane %v1283_v24, 4 }
 0x4fe   : > { %v1336_v27 = vperm.slane %v1328_v25, %v3754_v47  ;;  %v1351_v28 = vrot.slane %v1332_v23, 4  ;;  %v1344_v29 = vperm.slane %v1338_v41, %v3754_v47  ;;  %v2976_v25 = vld [vmem:[%s4364_s5 + $0x8] sm:$0xff]  ;;  %v2975_v41 = vld [vmem:[%s4364_s5] sm:$0xff] }
 0x4ff   : > { %v1340_v31 = vsel %vm757_vm5, %v1321_v40, %v1339_v26  ;;  %1482 = vmatpush.bf16.msra.mxu1 %v2976_v25 }
 0x500   : > { %v1363_v32 = vrot.slane %v1336_v27, 4  ;;  %v1348_v34 = vperm.slane %v1340_v31, %v3754_v47  ;;  %v1349_v35 = vrot.slane %v1344_v29, 4  ;;  %v1352_v37 = vsel %vm757_vm5, %v1344_v29, %v1351_v28  ;;  %v1304_v36 = vpop.f32.mrf.mxu3 }
 0x501   : > { %v1360_v39 = vperm.slane %v1352_v37, %v3764_v62 }
 0x502   : > { %v1350_v42 = vsel %vm757_vm5, %v1349_v35, %v1332_v23  ;;  %v1361_v43 = vrot.slane %v1348_v34, 4  ;;  %v1364_v44 = vsel %vm757_vm5, %v1348_v34, %v1363_v32  ;;  %v1266_v45 = vpop.f32.mrf.mxu1  ;;  %v3145_v35 = vld [vmem:[%s4365_s6] ss:$0 sm:$0xff] }
 0x503   : > { %v1356_v46 = vperm.slane %v1350_v42, %v3764_v62  ;;  %v1372_v48 = vperm.slane %v1364_v44, %v3764_v62  ;;  %v1375_v49 = vrot.slane %v1360_v39, 4  ;;  %1483 = vmatpush.bf16.msra.mxu1 %v2975_v41 }
 0x504   : > { %v1362_v50 = vsel %vm757_vm5, %v1361_v43, %v1336_v27  ;;  %v1285_v51 = vpop.f32.mrf.mxu2 }
 0x505   : > { %v1368_v52 = vperm.slane %v1362_v50, %v3764_v62  ;;  %v1373_v53 = vrot.slane %v1356_v46, 4  ;;  %v1376_v54 = vsel %vm757_vm5, 0.0, %v1375_v49  ;;  %v1379_v55 = vrot.slane %v1372_v48, 4  ;;  %v2978_v50 = vld [vmem:[%s4368_s9 + $0x8] sm:$0xff] }
 0x506   : > { %v1386_v56 = vrot.slane %v1376_v54, 4  ;;  %v1381_v60 = vsel %vm757_vm5, %v1375_v49, %v1356_v46  ;;  %1552 = vmatpush.bf16.msra.mxu2 %v2978_v50 }
 0x507   : > { %v1374_v57 = vsel %vm757_vm5, 0.0, %v1373_v53  ;;  %v1377_v58 = vrot.slane %v1368_v52, 4  ;;  %v1380_v59 = vsel %vm757_vm5, 0.0, %v1379_v55  ;;  %v1392_v0 = vsel %vm757_vm5, %v1379_v55, %v1368_v52 }
 0x508   : > { %v1387_v61 = vsel %vm757_vm5, %v1386_v56, %v1374_v57  ;;  %v1397_v63 = vrot.slane %v1380_v59, 4  ;;  %v1396_v3 = vperm.slane %v1392_v0, %v3754_v47  ;;  %v1385_v5 = vperm.slane %v1381_v60, %v3754_v47  ;;  %v3146_v60 = vld [vmem:[#allocation7] ss:$0 sm:$0xff] }
 0x509   : > { %v1378_v1 = vsel %vm757_vm5, 0.0, %v1377_v58  ;;  %v1391_v2 = vperm.slane %v1387_v61, %v3754_v47 }
 0x50a   : > { %v1398_v4 = vsel %vm757_vm5, %v1397_v63, %v1378_v1  ;;  %v1417_v9 = vrot.slane %v1396_v3, 4  ;;  %v1405_v16 = vrot.slane %v1385_v5, 4  ;;  %v3147_v63 = vld [vmem:[%s4367_s8] ss:$0 sm:$0xff] }
 0x50b   : > { %v1402_v6 = vperm.slane %v1398_v4, %v3754_v47  ;;  %v1403_v7 = vrot.slane %v1391_v2, 4  ;;  %v2982_v4 = vld [vmem:[%s4370_s11 + $0x18] sm:$0xff] }
 0x50c   : > { %v1406_v20 = vsel %vm757_vm5, %v1391_v2, %v1405_v16  ;;  %1613 = vmatpush.bf16.msra.mxu3 %v2982_v4 }
 0x50d   : > { %v1404_v10 = vsel %vm757_vm5, %v1403_v7, %v1385_v5  ;;  %v1415_v11 = vrot.slane %v1402_v6, 4  ;;  %v1418_v14 = vsel %vm757_vm5, %v1402_v6, %v1417_v9  ;;  %v1414_v22 = vperm.slane %v1406_v20, %v3764_v62  ;;  %v2981_v5 = vld [vmem:[%s4370_s11 + $0x10] sm:$0xff]  ;;  %v2980_v6 = vld [vmem:[%s4370_s11 + $0x8] sm:$0xff]  ;;  %v2979_v7 = vld [vmem:[%s4370_s11] sm:$0xff] }
 0x50e   : > { %v1410_v12 = vperm.slane %v1404_v10, %v3764_v62  ;;  %v1426_v18 = vperm.slane %v1418_v14, %v3764_v62  ;;  %v3148_v9 = vld [vmem:[%s4369_s10] ss:$0 sm:$0xff] }
 0x50f   : > { %v1416_v13 = vsel %vm757_vm5, %v1415_v11, %v1396_v3  ;;  %v1433_v23 = vrot.slane %v1414_v22, 4 }
 0x510   : > { %v1422_v15 = vperm.slane %v1416_v13, %v3764_v62  ;;  %v1429_v33 = vrot.slane %v1410_v12, 4  ;;  %v1431_v21 = vrot.slane %v1426_v18, 4  ;;  %1614 = vmatpush.bf16.msra.mxu3 %v2981_v5 }
 0x511   : > { %v1434_v24 = vsel %vm757_vm5, %v1426_v18, %v1433_v23 }
 0x512   : > { %v1427_v40 = vrot.slane %v1422_v15, 4  ;;  %v1430_v17 = vsel %vm757_vm5, %v1422_v15, %v1429_v33  ;;  %v1432_v38 = vsel %vm757_vm5, %v1431_v21, %v1414_v22  ;;  %v3149_v21 = vld [vmem:[%s4371_s12] ss:$0 sm:$0xff] }
 0x513   : > { %1436 = vrot.lane.b32.xlu0 %v1430_v17, %s4388_s29 }
 0x514   : > { %v1428_v19 = vsel %vm757_vm5, %v1427_v40, %v1410_v12  ;;  %1615 = vmatpush.bf16.msra.mxu3 %v2980_v6 }
 0x518   : > { %1616 = vmatpush.bf16.msra.mxu3 %v2979_v7 }
 0x51b   : > { %1440 = vrot.lane.b32.xlu0 %v1432_v38, %s4389_s22 }
 0x523   : > { %1444 = vrot.lane.b32.xlu0 %v1434_v24, %s4387_s26 }
 0x585   : > { %v1437_v26 = vpop.permute.xlu0 %1436 }
 0x586   : > { %v1447_v28 = vsel %vm1123_vm6, %v1428_v19, %v1437_v26 }
 0x58d   : > { %v1441_v27 = vpop.permute.xlu0 %1440 }
 0x58e   : > { %v1449_v29 = vsel %vm1448_vm8, %v1447_v28, %v1441_v27 }
 0x595   : > { %v1445_v31 = vpop.permute.xlu0 %1444 }
 0x596   : > { %v1451_v32 = vsel %vm1450_vm9, %v1449_v29, %v1445_v31  ;;  %v2984_v31 = vld [vmem:[%s4418_s3 + $0x18] sm:$0xff] }
 0x597   : > { %v1452_v34 = vpack.c.bf16 %v1451_v32, %v1451_v32  ;;  %1687 = vmatpush.bf16.msrb.mxu0 %v2984_v31  ;;  %v2983_v32 = vld [vmem:[%s4418_s3 + $0x10] sm:$0xff] }
 0x599   : > { %2855 = vmatmul.msk.bf16.vlgmr.msra.gmra.mxu1 %vm671_vm0, %v1452_v34 }
 0x59b   : > { %1688 = vmatpush.bf16.msrb.mxu0 %v2983_v32 }
 0x616   : > { %v1485_v37 = vpop.f32.mrf.mxu1 }
 0x617   : > { %v1486_v36 = vadd.f32 %v3145_v35, %v1485_v37 }
 0x619   : > { %v1489_v39 = vadd.f32 %v1486_v36, %v3733_v30  ;;  %v2977_v30 = vld [vmem:[%s4368_s9] sm:$0xff] }
 0x61a   : > { %1553 = vmatpush.bf16.msra.mxu2 %v2977_v30 }
 0x61b   : > { %v1492_v42 = vsel %vm671_vm0, %v1489_v39, 0.0 }
 0x61c   : > { %1493 = vadd.xlane.f32.xlu1 %v1492_v42 }
 0x61e   : > { %v1487_v43 = vpop.f32.mrf.mxu1 }
 0x68f   : > { %v1494_v44 = vpop.xlane.xlu1 %1493 }
 0x690   : > { %v1495_v45 = vmul.f32 %v1494_v44, %v3719_v8 }
 0x692   : > { %v1496_v46 = vsub.f32 %v1489_v39, %v1495_v45 }
 0x694   : > { %v1497_v48 = vmul.f32 %v1496_v46, %v1496_v46 }
 0x696   : > { %v1498_v49 = vsel %vm671_vm0, %v1497_v48, 0.0 }
 0x697   : > { %1499 = vadd.xlane.f32.xlu0 %v1498_v49  ;;  %v3151_v49 = vld [vmem:[%s4373_s14] ss:$0 sm:$0xff] }
 0x70a   : > { %v1500_v51 = vpop.xlane.xlu0 %1499 }
 0x70b   : > { %v1501_v52 = vmul.f32 %v1500_v51, %v3719_v8 }
 0x70d   : > { %v1502_v53 = vadd.f32 1e-12, %v1501_v52 }
 0x70f   : > { %3180 = vrsqrt.f32 %v1502_v53  ;;  %vm1509_vm11 = vweird.f32 %v1502_v53 }
 0x715   : > { %v3181_v54 = vpop.eup %3180 }
 0x716   : > { %v1504_v55 = vmul.f32 %v3181_v54, %v1502_v53  ;;  %vm1510_vm10 = vweird.f32 %v3181_v54  ;;  %v3152_v53 = vld [vmem:[%s4420_s4 + $0x1] ss:$0 sm:$0xff] }
 0x717   : > { %vm1511_vm12 = vmor %vm1509_vm11, %vm1510_vm10 }
 0x718   : > { %v1505_v56 = vmul.f32 %v3181_v54, %v1504_v55 }
 0x71a   : > { %v1506_v57 = vmul.f32 0.5, %v1505_v56 }
 0x71c   : > { %v1507_v58 = vsub.f32 1.5, %v1506_v57 }
 0x71e   : > { %v1508_v59 = vmul.f32 %v3181_v54, %v1507_v58 }
 0x720   : > { %v1512_v61 = vsel %vm1511_vm12, %v3181_v54, %v1508_v59 }
 0x721   : > { %v1513_v0 = vmul.f32 %v1512_v61, %v1496_v46  ;;  %v3150_v46 = vld [vmem:[#allocation8] ss:$0 sm:$0xff] }
 0x723   : > { %v1517_v1 = vmul.f32 %v3146_v60, %v1513_v0 }
 0x725   : > { %v1521_v2 = vadd.f32 %v3147_v63, %v1517_v1 }
 0x727   : > { %v1522_v3 = vpack.c.bf16 %v1521_v2, %v1521_v2 }
 0x729   : > { %2864 = vmatmul.msk.bf16.vlgmr.msra.gmra.mxu2 %vm671_vm0, %v1522_v3 }
 0x7ac   : > { %v1555_v10 = vpop.f32.mrf.mxu2 }
 0x7ad   : > { %v1556_v11 = vadd.f32 %v3148_v9, %v1555_v10 }
 0x7af   : > { %v1560_v12 = vmul.f32 0.044715, %v1556_v11  ;;  %v1559_v17 = vmul.f32 0.5, %v1556_v11 }
 0x7b1   : > { %v1561_v13 = vmul.f32 %v1560_v12, %v1556_v11 }
 0x7b3   : > { %v1562_v14 = vmul.f32 %v1561_v13, %v1556_v11 }
 0x7b4   : > { %v1557_v15 = vpop.f32.mrf.mxu2 }
 0x7b5   : > { %v1563_v33 = vadd.f32 %v1562_v14, %v1556_v11 }
 0x7b7   : > { %v1564_v16 = vmul.f32 0.7978846, %v1563_v33 }
 0x7b9   : > { %3182 = vtanh.f32 %v1564_v16 }
 0x7bf   : > { %v3183_v40 = vpop.eup %3182 }
 0x7c0   : > { %v1566_v18 = vadd.f32 1.0, %v3183_v40 }
 0x7c2   : > { %v1567_v19 = vmul.f32 %v1566_v18, %v1559_v17 }
 0x7c4   : > { %v1568_v20 = vpack.c.bf16 %v1567_v19, %v1567_v19 }
 0x7c6   : > { %2881 = vmatmul.msk.bf16.vlgmr.msra.gmra.mxu3 %vm1605_vm13, %v1568_v20 }
 0x849   : > { %v1618_v22 = vpop.f32.mrf.mxu3 }
 0x84a   : > { %v1619_v38 = vadd.f32 %v3149_v21, %v1618_v22 }
 0x84c   : > { %v1622_v23 = vadd.f32 %v1619_v38, %v1521_v2 }
 0x84e   : > { %v1625_v24 = vsel %vm671_vm0, %v1622_v23, 0.0 }
 0x84f   : > { %1626 = vadd.xlane.f32.xlu2 %v1625_v24 }
 0x851   : > { %v1620_v25 = vpop.f32.mrf.mxu3 }
 0x8c2   : > { %v1627_v41 = vpop.xlane.xlu2 %1626 }
 0x8c3   : > { %v1628_v26 = vmul.f32 %v1627_v41, %v3719_v8 }
 0x8c5   : > { %v1629_v27 = vsub.f32 %v1622_v23, %v1628_v26 }
 0x8c7   : > { %v1630_v28 = vmul.f32 %v1629_v27, %v1629_v27 }
 0x8c9   : > { %v1631_v29 = vsel %vm671_vm0, %v1630_v28, 0.0 }
 0x8ca   : > { %1632 = vadd.xlane.f32.xlu1 %v1631_v29 }
 0x93d   : > { %v1633_v34 = vpop.xlane.xlu1 %1632 }
 0x93e   : > { %v1634_v35 = vmul.f32 %v1633_v34, %v3719_v8 }
 0x940   : > { %v1635_v37 = vadd.f32 1e-12, %v1634_v35 }
 0x942   : > { %3184 = vrsqrt.f32 %v1635_v37  ;;  %vm1642_vm15 = vweird.f32 %v1635_v37 }
 0x948   : > { %v3185_v36 = vpop.eup %3184 }
 0x949   : > { %v1637_v39 = vmul.f32 %v3185_v36, %v1635_v37  ;;  %vm1643_vm14 = vweird.f32 %v3185_v36 }
 0x94a   : > { %vm1644_vm1 = vmor %vm1642_vm15, %vm1643_vm14 }
 0x94b   : > { %v1638_v42 = vmul.f32 %v3185_v36, %v1637_v39 }
 0x94d   : > { %v1639_v43 = vmul.f32 0.5, %v1638_v42 }
 0x94f   : > { %v1640_v44 = vsub.f32 1.5, %v1639_v43 }
 0x951   : > { %v1641_v45 = vmul.f32 %v3185_v36, %v1640_v44 }
 0x953   : > { %v1645_v48 = vsel %vm1644_vm1, %v3185_v36, %v1641_v45 }
 0x954   : > { %v1646_v50 = vmul.f32 %v1645_v48, %v1629_v27 }
 0x956   : > { %v1650_v30 = vmul.f32 %v3150_v46, %v1646_v50 }
 0x958   : > { %v4023_v51 = vadd.f32 %v3151_v49, %v1650_v30 }
 0x95a   : > { %v1655_v52 = vpack.c.bf16 %v4023_v51, %v4023_v51 }
 0x95c   : > { %2895 = vmatmul.msk.bf16.vlgmr.msrb.gmra.mxu0 %vm671_vm0, %v1655_v52 }
 0x9d9   : > { %v1690_v54 = vpop.f32.mrf.mxu0 }
 0x9da   : > { %v1691_v55 = vadd.f32 %v3152_v53, %v1690_v54 }
 0x9dc   : > { %1698 = vrot.lane.b32.xlu1 %v1691_v55, %s3479_s24  ;;  %1695 = vrot.lane.b32.xlu2 %v1691_v55, %s3478_s16  ;;  %v1706_v0 = vrot.slane %v1691_v55, 4  ;;  %s4422_s16 = smov 8   ;;  %s4423_s24 = smov 24  }
 0x9e1   : > { %v1692_v56 = vpop.f32.mrf.mxu0 }
 0x9e4   : > { %1701 = vrot.lane.b32.xlu2 %v1691_v55, %s3477_s20  ;;  %s4421_s20 = smov 16  }
 0xa36   : > { %v1696_v57 = vpop.permute.xlu2 %1695 }
 0xa37   : > { %v4034_v58 = vpack.i.bf16 %v1696_v57, %v1691_v55  ;;  %v1718_v6 = vrot.slane %v1696_v57, 4 }
 0xa39   : > { %3123 = vrot.lane.b32.xlu1 %v4034_v58, %s3480_s1 }
 0xa3e   : > { %v1702_v59 = vpop.permute.xlu2 %1701 }
 0xa3f   : > { %v1716_v3 = vrot.slane %v1702_v59, 4  ;;  %v1719_v9 = vsel %vm757_vm5, %v1702_v59, %v1718_v6 }
 0xa40   : > { %v1727_v13 = vperm.slane %v1719_v9, %v3754_v47 }
 0xa41   : > { %v1717_v7 = vsel %vm757_vm5, %v1716_v3, %v1696_v57 }
 0xa42   : > { %v1723_v12 = vperm.slane %v1717_v7, %v3754_v47  ;;  %v1740_v17 = vrot.slane %v1727_v13, 4 }
 0xa44   : > { %v1728_v40 = vrot.slane %v1723_v12, 4 }
 0xa4e   : > { %v1699_v60 = vpop.permute.xlu1 %1698 }
 0xa4f   : > { %v4038_v61 = vpack.i.bf16 %v1702_v59, %v1699_v60  ;;  %v1704_v63 = vrot.slane %v1699_v60, 4  ;;  %v1707_v2 = vsel %vm757_vm5, %v1699_v60, %v1706_v0 }
 0xa50   : > { %v1715_v5 = vperm.slane %v1707_v2, %v3754_v47 }
 0xa51   : > { %3128 = vrot.lane.b32.xlu2 %v4038_v61, %s3480_s1  ;;  %v1705_v1 = vsel %vm757_vm5, %v1704_v63, %v1691_v55 }
 0xa52   : > { %v1711_v4 = vperm.slane %v1705_v1, %v3754_v47  ;;  %v1742_v11 = vrot.slane %v1715_v5, 4  ;;  %v1741_v19 = vsel %vm757_vm5, %v1740_v17, %v1715_v5 }
 0xa53   : > { %v1747_v38 = vperm.slane %v1741_v19, %v3764_v62 }
 0xa54   : > { %v1730_v10 = vrot.slane %v1711_v4, 4  ;;  %v1743_v15 = vsel %vm757_vm5, %v1727_v13, %v1742_v11  ;;  %v1729_v18 = vsel %vm757_vm5, %v1728_v40, %v1711_v4 }
 0xa55   : > { %v1751_v16 = vperm.slane %v1743_v15, %v3764_v62  ;;  %v1735_v22 = vperm.slane %v1729_v18, %v3764_v62  ;;  %v1756_v32 = vrot.slane %v1747_v38, 4 }
 0xa56   : > { %v1731_v14 = vsel %vm757_vm5, %v1723_v12, %v1730_v10 }
 0xa57   : > { %v1739_v33 = vperm.slane %v1731_v14, %v3764_v62  ;;  %v1758_v21 = vrot.slane %v1751_v16, 4  ;;  %v1752_v31 = vrot.slane %v1735_v22, 4  ;;  %v1757_v55 = vsel %vm757_vm5, 0.0, %v1756_v32 }
 0xa59   : > { %v1754_v20 = vrot.slane %v1739_v33, 4  ;;  %v1759_v24 = vsel %vm757_vm5, 0.0, %v1758_v21  ;;  %v1907_v43 = vsel %vm757_vm5, %v1758_v21, %v1747_v38  ;;  %v1753_v54 = vsel %vm757_vm5, 0.0, %v1752_v31 }
 0xa5a   : > { %v1912_v44 = vrot.slane %v1759_v24, 4  ;;  %v1911_v1 = vperm.slane %v1907_v43, %v3754_v47 }
 0xa5b   : > { %v1755_v23 = vsel %vm757_vm5, 0.0, %v1754_v20  ;;  %v1896_v39 = vsel %vm757_vm5, %v1754_v20, %v1735_v22 }
 0xa5c   : > { %v1901_v42 = vrot.slane %v1755_v23, 4  ;;  %v1900_v63 = vperm.slane %v1896_v39, %v3754_v47  ;;  %v1913_v2 = vsel %vm757_vm5, %v1912_v44, %v1757_v55  ;;  %v1932_v40 = vrot.slane %v1911_v1, 4 }
 0xa5d   : > { %v1917_v33 = vperm.slane %v1913_v2, %v3754_v47 }
 0xa5e   : > { %v1902_v0 = vsel %vm757_vm5, %v1901_v42, %v1753_v54  ;;  %v1920_v19 = vrot.slane %v1900_v63, 4 }
 0xa5f   : > { %v1906_v16 = vperm.slane %v1902_v0, %v3754_v47 }
 0xaab   : > { %v3124_v25 = vpop.permute.xlu1 %3123  ;;  %v3129_v41 = vpop.permute.xlu2 %3128 }
 0xaac   : > { %v3126_v26 = vunpack.i.h.bf16 %v3124_v25  ;;  %v3125_v27 = vunpack.i.l.bf16 %v3124_v25  ;;  %v3131_v28 = vunpack.i.h.bf16 %v3129_v41  ;;  %v3130_v29 = vunpack.i.l.bf16 %v3129_v41 }
 0xaae   : > { %v1786_v34 = vrot.slane %v3126_v26, 4  ;;  %v1774_v35 = vrot.slane %v3125_v27, 4  ;;  %v1784_v37 = vrot.slane %v3131_v28, 4  ;;  %v1772_v36 = vrot.slane %v3130_v29, 4 }
 0xab0   : > { %v1785_v45 = vsel %vm757_vm5, %v1784_v37, %v3126_v26  ;;  %v1787_v46 = vsel %vm757_vm5, %v3131_v28, %v1786_v34  ;;  %v1773_v48 = vsel %vm757_vm5, %v1772_v36, %v3125_v27  ;;  %v1775_v49 = vsel %vm757_vm5, %v3130_v29, %v1774_v35 }
 0xab1   : > { %v1791_v50 = vperm.slane %v1785_v45, %v3754_v47  ;;  %v1795_v30 = vperm.slane %v1787_v46, %v3754_v47  ;;  %v1779_v52 = vperm.slane %v1773_v48, %v3754_v47  ;;  %v1783_v53 = vperm.slane %v1775_v49, %v3754_v47 }
 0xab2   : > { %v1930_v26 = vrot.slane %v1917_v33, 4  ;;  %v1918_v29 = vrot.slane %v1906_v16, 4  ;;  %v1921_v37 = vsel %vm757_vm5, %v1906_v16, %v1920_v19  ;;  %v1933_v36 = vsel %vm757_vm5, %v1917_v33, %v1932_v40 }
 0xab3   : > { %v1796_v56 = vrot.slane %v1791_v50, 4  ;;  %v1808_v57 = vrot.slane %v1795_v30, 4  ;;  %v1798_v59 = vrot.slane %v1779_v52, 4  ;;  %v1810_v60 = vrot.slane %v1783_v53, 4 }
 0xab4   : > { %v1919_v48 = vsel %vm757_vm5, %v1918_v29, %v1900_v63  ;;  %v1931_v49 = vsel %vm757_vm5, %v1930_v26, %v1911_v1 }
 0xab5   : > { %v1797_v3 = vsel %vm757_vm5, %v1796_v56, %v1779_v52  ;;  %v1799_v4 = vsel %vm757_vm5, %v1791_v50, %v1798_v59  ;;  %v1809_v5 = vsel %vm757_vm5, %v1808_v57, %v1783_v53  ;;  %v1811_v6 = vsel %vm757_vm5, %v1795_v30, %v1810_v60 }
 0xab6   : > { %v1803_v7 = vperm.slane %v1797_v3, %v3764_v62  ;;  %v1807_v9 = vperm.slane %v1799_v4, %v3764_v62  ;;  %v1815_v10 = vperm.slane %v1809_v5, %v3764_v62  ;;  %v1819_v11 = vperm.slane %v1811_v6, %v3764_v62 }
 0xab7   : > { %v1929_v52 = vperm.slane %v1921_v37, %v3764_v62  ;;  %v1941_v53 = vperm.slane %v1933_v36, %v3764_v62  ;;  %v1925_v59 = vperm.slane %v1919_v48, %v3764_v62  ;;  %v1937_v60 = vperm.slane %v1931_v49, %v3764_v62 }
 0xab8   : > { %v1820_v12 = vrot.slane %v1803_v7, 4  ;;  %v1822_v13 = vrot.slane %v1807_v9, 4  ;;  %v1824_v14 = vrot.slane %v1815_v10, 4  ;;  %v1826_v15 = vrot.slane %v1819_v11, 4 }
 0xab9   : > { %v1948_v9 = vrot.slane %v1929_v52, 4 }
 0xaba   : > { %v1823_v17 = vsel %vm757_vm5, 0.0, %v1822_v13  ;;  %v1827_v18 = vsel %vm757_vm5, 0.0, %v1826_v15  ;;  %v1965_v21 = vsel %vm757_vm5, %v1826_v15, %v1815_v10  ;;  %v1954_v38 = vsel %vm757_vm5, %v1822_v13, %v1803_v7 }
 0xabb   : > { %v1959_v20 = vrot.slane %v1823_v17, 4  ;;  %v1970_v22 = vrot.slane %v1827_v18, 4  ;;  %v1821_v23 = vsel %vm757_vm5, 0.0, %v1820_v12  ;;  %v1825_v24 = vsel %vm757_vm5, 0.0, %v1824_v14 }
 0xabc   : > { %v1969_v25 = vperm.slane %v1965_v21, %v3754_v47  ;;  %v1958_v41 = vperm.slane %v1954_v38, %v3754_v47  ;;  %v1946_v7 = vrot.slane %v1941_v53, 4  ;;  %v1942_v14 = vrot.slane %v1937_v60, 4 }
 0xabd   : > { %v1960_v27 = vsel %vm757_vm5, %v1959_v20, %v1821_v23  ;;  %v1971_v28 = vsel %vm757_vm5, %v1970_v22, %v1825_v24  ;;  %v1944_v15 = vrot.slane %v1925_v59, 4  ;;  %v1949_v17 = vsel %vm757_vm5, %v1941_v53, %v1948_v9 }
 0xabe   : > { %v1964_v31 = vperm.slane %v1960_v27, %v3754_v47  ;;  %v1975_v32 = vperm.slane %v1971_v28, %v3754_v47  ;;  %v1978_v34 = vrot.slane %v1958_v41, 4  ;;  %v1990_v35 = vrot.slane %v1969_v25, 4 }
 0xabf   : > { %v1947_v40 = vsel %vm757_vm5, %v1946_v7, %v1929_v52  ;;  %v1943_v18 = vsel %vm757_vm5, %v1942_v14, %v1925_v59  ;;  %v1945_v19 = vsel %vm757_vm5, %v1937_v60, %v1944_v15  ;;  %v1953_v21 = vpack.c.bf16 %v1949_v17, %v1949_v17 }
 0xac0   : > { %v1979_v39 = vsel %vm757_vm5, %v1964_v31, %v1978_v34  ;;  %v1991_v42 = vsel %vm757_vm5, %v1975_v32, %v1990_v35  ;;  %v1976_v43 = vrot.slane %v1964_v31, 4  ;;  %v1988_v44 = vrot.slane %v1975_v32, 4 }
 0xac1   : > { %v1987_v45 = vperm.slane %v1979_v39, %v3764_v62  ;;  %v1999_v46 = vperm.slane %v1991_v42, %v3764_v62  ;;  %v1952_v20 = vpack.c.bf16 %v1947_v40, %v1947_v40  ;;  %v1950_v22 = vpack.c.bf16 %v1943_v18, %v1943_v18 }
 0xac2   : > { %v1977_v50 = vsel %vm757_vm5, %v1976_v43, %v1958_v41  ;;  %v1989_v30 = vsel %vm757_vm5, %v1988_v44, %v1969_v25  ;;  %v1951_v38 = vpack.c.bf16 %v1945_v19, %v1945_v19 }
 0xac3   : > { %v2004_v54 = vrot.slane %v1999_v46, 4  ;;  %v2006_v55 = vrot.slane %v1987_v45, 4  ;;  %v1983_v56 = vperm.slane %v1977_v50, %v3764_v62  ;;  %v1995_v57 = vperm.slane %v1989_v30, %v3764_v62 }
 0xac5   : > { %v2005_v63 = vsel %vm757_vm5, %v2004_v54, %v1987_v45  ;;  %v2007_v0 = vsel %vm757_vm5, %v1999_v46, %v2006_v55  ;;  %v2000_v1 = vrot.slane %v1995_v57, 4  ;;  %v2002_v2 = vrot.slane %v1983_v56, 4 }
 0xac6   : > { %v2010_v3 = vpack.c.bf16 %v2005_v63, %v2005_v63  ;;  %v2011_v4 = vpack.c.bf16 %v2007_v0, %v2007_v0 }
 0xac7   : > { %v2001_v5 = vsel %vm757_vm5, %v2000_v1, %v1983_v56  ;;  %v2003_v6 = vsel %vm757_vm5, %v1995_v57, %v2002_v2 }
 0xac8   : > { %v2112_v10 = vsel %vm1123_vm6, %v2010_v3, 0  ;;  %v2131_v11 = vsel %vm1123_vm6, %v2011_v4, 0  ;;  %v2008_v12 = vpack.c.bf16 %v2001_v5, %v2001_v5  ;;  %v2009_v13 = vpack.c.bf16 %v2003_v6, %v2003_v6 }
 0xac9   : > { %2121 = vmatpush.bf16.xpose.msrb.mxu3 %v2112_v10  ;;  %2140 = vmatpush.bf16.xpose.msra.mxu0 %v2131_v11 }
 0xaca   : > { %v2074_v33 = vsel %vm1123_vm6, %v2008_v12, 0  ;;  %v2093_v16 = vsel %vm1123_vm6, %v2009_v13, 0 }
 0xacb   : > { %2083 = vmatpush.bf16.xpose.msrb.mxu1 %v2074_v33  ;;  %2102 = vmatpush.bf16.xpose.msrb.mxu2 %v2093_v16 }
 0xad0   : > { %2898 = vmatmul.msk.bf16.vlgmr.msrb.gmra.mxu3 %vm1123_vm6, %v1952_v20  ;;  %2899 = vmatmul.msk.bf16.vlgmr.msra.gmra.mxu0 %vm1123_vm6, %v1953_v21 }
 0xad2   : > { %2896 = vmatmul.msk.bf16.vlgmr.msrb.gmra.mxu1 %vm1123_vm6, %v1950_v22  ;;  %2897 = vmatmul.msk.bf16.vlgmr.msrb.gmra.mxu2 %vm1123_vm6, %v1951_v38 }
 0xb4d   : > { %v2142_v23 = vpop.f32.mrf.mxu0 }
 0xb4e   : > { %v2155_v34 = vsel %vm1123_vm6, %v2142_v23, -inf }
 0xb4f   : > { %v2085_v24 = vpop.f32.mrf.mxu1 }
 0xb50   : > { %v2146_v25 = vsel %vm1123_vm6, %v2085_v24, -inf }
 0xb51   : > { %2147 = vmax.xlane.f32.xlu2 %v2146_v25 }
 0xb53   : > { %v2123_v41 = vpop.f32.mrf.mxu3 }
 0xb54   : > { %v2152_v26 = vsel %vm1123_vm6, %v2123_v41, -inf }
 0xb55   : > { %v2144_v27 = vpop.f32.mrf.mxu0  ;;  %2153 = vmax.xlane.f32.xlu0 %v2152_v26  ;;  %v2104_v28 = vpop.f32.mrf.mxu2 }
 0xb56   : > { %v2149_v29 = vsel %vm1123_vm6, %v2104_v28, -inf }
 0xb57   : > { %2150 = vmax.xlane.f32.xlu1 %v2149_v29  ;;  %v2087_v31 = vpop.f32.mrf.mxu1 }
 0xb5b   : > { %v2125_v32 = vpop.f32.mrf.mxu3 }
 0xb5d   : > { %2156 = vmax.xlane.f32.xlu0 %v2155_v34  ;;  %v2106_v35 = vpop.f32.mrf.mxu2 }
 0xb71   : > { %3133 = vrot.lane.b32.xlu0 %v4034_v58, %s3483_s27 }
 0xb79   : > { %3138 = vrot.lane.b32.xlu0 %v4038_v61, %s3483_s27  ;;  %s4425_s27 = sld [smem:[#allocation33_spill]] }
 0xb7f   : > { %s4426_s13 = smov %s4425_s27 }
 0xbc4   : > { %v2148_v37 = vpop.xlane.xlu2 %2147 }
 0xbc5   : > { %v2158_v36 = vsub.f32 %v2085_v24, %v2148_v37 }
 0xbc7   : > { %v2162_v39 = vmul.f32 1.442695, %v2158_v36 }
 0xbc8   : > { %v2154_v42 = vpop.xlane.xlu0 %2153 }
 0xbc9   : > { %3186 = vpow2.f32 %v2162_v39  ;;  %v2160_v43 = vsub.f32 %v2123_v41, %v2154_v42 }
 0xbca   : > { %v2151_v44 = vpop.xlane.xlu1 %2150 }
 0xbcb   : > { %v2166_v45 = vmul.f32 1.442695, %v2160_v43  ;;  %v2159_v46 = vsub.f32 %v2104_v28, %v2151_v44 }
 0xbcd   : > { %3188 = vpow2.f32 %v2166_v45  ;;  %v2164_v48 = vmul.f32 1.442695, %v2159_v46 }
 0xbcf   : > { %v4138_v49 = vpop.eup %3186  ;;  %3190 = vpow2.f32 %v2164_v48 }
 0xbd0   : > { %v2157_v50 = vpop.xlane.xlu0 %2156  ;;  %v2170_v58 = vsel %vm1123_vm6, %v4138_v49, 0.0 }
 0xbd1   : > { %v2161_v30 = vsub.f32 %v2142_v23, %v2157_v50  ;;  %2171 = vadd.xlane.f32.xlu2 %v2170_v58 }
 0xbd3   : > { %v4142_v61 = vpop.eup %3188  ;;  %v2168_v52 = vmul.f32 1.442695, %v2161_v30 }
 0xbd4   : > { %v2176_v53 = vsel %vm1123_vm6, %v4142_v61, 0.0 }
 0xbd5   : > { %v4146_v54 = vpop.eup %3190  ;;  %3192 = vpow2.f32 %v2168_v52  ;;  %2177 = vadd.xlane.f32.xlu0 %v2176_v53 }
 0xbd6   : > { %v2173_v55 = vsel %vm1123_vm6, %v4146_v54, 0.0 }
 0xbd7   : > { %2174 = vadd.xlane.f32.xlu1 %v2173_v55 }
 0xbdb   : > { %v4150_v56 = vpop.eup %3192 }
 0xbdc   : > { %v2179_v57 = vsel %vm1123_vm6, %v4150_v56, 0.0 }
 0xbdf   : > { %2180 = vadd.xlane.f32.xlu1 %v2179_v57 }
 0xbe3   : > { %v3134_v59 = vpop.permute.xlu0 %3133 }
 0xbe4   : > { %v3136_v60 = vunpack.i.h.bf16 %v3134_v59  ;;  %v3135_v63 = vunpack.i.l.bf16 %v3134_v59 }
 0xbe6   : > { %v1854_v1 = vrot.slane %v3136_v60, 4  ;;  %v1842_v2 = vrot.slane %v3135_v63, 4 }
 0xbeb   : > { %v3139_v0 = vpop.permute.xlu0 %3138 }
 0xbec   : > { %v3141_v3 = vunpack.i.h.bf16 %v3139_v0  ;;  %v3140_v4 = vunpack.i.l.bf16 %v3139_v0 }
 0xbee   : > { %v1852_v5 = vrot.slane %v3141_v3, 4  ;;  %v1840_v6 = vrot.slane %v3140_v4, 4  ;;  %v1843_v7 = vsel %vm757_vm5, %v3140_v4, %v1842_v2  ;;  %v1855_v9 = vsel %vm757_vm5, %v3141_v3, %v1854_v1 }
 0xbef   : > { %v1851_v10 = vperm.slane %v1843_v7, %v3754_v47  ;;  %v1863_v11 = vperm.slane %v1855_v9, %v3754_v47 }
 0xbf0   : > { %v1841_v12 = vsel %vm757_vm5, %v1840_v6, %v3135_v63  ;;  %v1853_v13 = vsel %vm757_vm5, %v1852_v5, %v3136_v60 }
 0xbf1   : > { %v1847_v14 = vperm.slane %v1841_v12, %v3754_v47  ;;  %v1859_v15 = vperm.slane %v1853_v13, %v3754_v47  ;;  %v1876_v33 = vrot.slane %v1863_v11, 4  ;;  %v1878_v16 = vrot.slane %v1851_v10, 4 }
 0xbf3   : > { %v1864_v40 = vrot.slane %v1859_v15, 4  ;;  %v1866_v17 = vrot.slane %v1847_v14, 4  ;;  %v1877_v18 = vsel %vm757_vm5, %v1876_v33, %v1851_v10  ;;  %v1879_v19 = vsel %vm757_vm5, %v1863_v11, %v1878_v16 }
 0xbf4   : > { %v1883_v20 = vperm.slane %v1877_v18, %v3764_v62  ;;  %v1887_v21 = vperm.slane %v1879_v19, %v3764_v62 }
 0xbf5   : > { %v1865_v22 = vsel %vm757_vm5, %v1864_v40, %v1847_v14  ;;  %v1867_v38 = vsel %vm757_vm5, %v1859_v15, %v1866_v17 }
 0xbf6   : > { %v1871_v23 = vperm.slane %v1865_v22, %v3764_v62  ;;  %v1875_v24 = vperm.slane %v1867_v38, %v3764_v62  ;;  %v1892_v25 = vrot.slane %v1883_v20, 4  ;;  %v1894_v41 = vrot.slane %v1887_v21, 4 }
 0xbf8   : > { %v1888_v26 = vrot.slane %v1871_v23, 4  ;;  %v1890_v27 = vrot.slane %v1875_v24, 4  ;;  %v1895_v28 = vsel %vm757_vm5, 0.0, %v1894_v41  ;;  %v2023_v29 = vsel %vm757_vm5, %v1894_v41, %v1883_v20 }
 0xbf9   : > { %v2028_v31 = vrot.slane %v1895_v28, 4  ;;  %v1893_v34 = vsel %vm757_vm5, 0.0, %v1892_v25  ;;  %v2027_v35 = vperm.slane %v2023_v29, %v3754_v47 }
 0xbfa   : > { %v1891_v32 = vsel %vm757_vm5, 0.0, %v1890_v27  ;;  %v2012_v37 = vsel %vm757_vm5, %v1890_v27, %v1871_v23  ;;  %v1889_v43 = vsel %vm757_vm5, 0.0, %v1888_v26 }
 0xbfb   : > { %v2017_v36 = vrot.slane %v1891_v32, 4  ;;  %v2016_v39 = vperm.slane %v2012_v37, %v3754_v47  ;;  %v2029_v42 = vsel %vm757_vm5, %v2028_v31, %v1893_v34  ;;  %v2048_v45 = vrot.slane %v2027_v35, 4 }
 0xbfc   : > { %v2033_v44 = vperm.slane %v2029_v42, %v3754_v47 }
 0xbfd   : > { %v2018_v46 = vsel %vm757_vm5, %v2017_v36, %v1889_v43  ;;  %v2036_v48 = vrot.slane %v2016_v39, 4 }
 0xbfe   : > { %v2022_v50 = vperm.slane %v2018_v46, %v3754_v47  ;;  %v2049_v58 = vsel %vm757_vm5, %v2033_v44, %v2048_v45  ;;  %v2046_v30 = vrot.slane %v2033_v44, 4 }
 0xbff   : > { %v2057_v52 = vperm.slane %v2049_v58, %v3764_v62 }
 0xc00   : > { %v2037_v53 = vsel %vm757_vm5, %v2022_v50, %v2036_v48  ;;  %v2034_v55 = vrot.slane %v2022_v50, 4  ;;  %v2047_v57 = vsel %vm757_vm5, %v2046_v30, %v2027_v35 }
 0xc01   : > { %v2045_v59 = vperm.slane %v2037_v53, %v3764_v62  ;;  %v2062_v60 = vrot.slane %v2057_v52, 4  ;;  %v2053_v63 = vperm.slane %v2047_v57, %v3764_v62 }
 0xc02   : > { %v2035_v0 = vsel %vm757_vm5, %v2034_v55, %v2016_v39 }
 0xc03   : > { %v2063_v1 = vsel %vm757_vm5, %v2062_v60, %v2045_v59  ;;  %v2041_v2 = vperm.slane %v2035_v0, %v3764_v62  ;;  %v2058_v3 = vrot.slane %v2053_v63, 4  ;;  %v2064_v4 = vrot.slane %v2045_v59, 4 }
 0xc04   : > { %v2068_v5 = vpack.c.bf16 %v2063_v1, %v2063_v1 }
 0xc05   : > { %v2059_v6 = vsel %vm757_vm5, %v2058_v3, %v2041_v2  ;;  %v2065_v7 = vsel %vm757_vm5, %v2057_v52, %v2064_v4  ;;  %v2060_v9 = vrot.slane %v2041_v2, 4 }
 0xc06   : > { %v2236_v10 = vsel %vm1251_vm7, %v2068_v5, 0  ;;  %v2066_v11 = vpack.c.bf16 %v2059_v6, %v2059_v6  ;;  %v2069_v12 = vpack.c.bf16 %v2065_v7, %v2065_v7 }
 0xc07   : > { %2245 = vmatpush.bf16.msra.mxu3 %v2236_v10  ;;  %v2061_v13 = vsel %vm757_vm5, %v2053_v63, %v2060_v9 }
 0xc08   : > { %v2198_v14 = vsel %vm1251_vm7, %v2066_v11, 0  ;;  %v2255_v15 = vsel %vm1251_vm7, %v2069_v12, 0  ;;  %v2067_v33 = vpack.c.bf16 %v2061_v13, %v2061_v13 }
 0xc09   : > { %2207 = vmatpush.bf16.msra.mxu1 %v2198_v14  ;;  %2264 = vmatpush.bf16.msrb.mxu0 %v2255_v15 }
 0xc0a   : > { %v2217_v16 = vsel %vm1251_vm7, %v2067_v33, 0 }
 0xc0b   : > { %2226 = vmatpush.bf16.msra.mxu2 %v2217_v16 }
 0xc44   : > { %v2172_v40 = vpop.xlane.xlu2 %2171 }
 0xc45   : > { %3194 = vrcp.f32 %v2172_v40 }
 0xc48   : > { %v2178_v17 = vpop.xlane.xlu0 %2177 }
 0xc49   : > { %3196 = vrcp.f32 %v2178_v17 }
 0xc4a   : > { %v2175_v18 = vpop.xlane.xlu1 %2174 }
 0xc4b   : > { %v3195_v19 = vpop.eup %3194  ;;  %3198 = vrcp.f32 %v2175_v18 }
 0xc4c   : > { %v2186_v20 = vmul.f32 %v3195_v19, %v4138_v49 }
 0xc4e   : > { %v2190_v21 = vpack.c.bf16 %v2186_v20, %v2186_v20 }
 0xc4f   : > { %v3197_v22 = vpop.eup %3196 }
 0xc50   : > { %v2188_v38 = vmul.f32 %v3197_v22, %v4142_v61  ;;  %2900 = vmatmul.msk.bf16.vlgmr.msra.gmra.mxu1 %vm1123_vm6, %v2190_v21 }
 0xc51   : > { %v3199_v23 = vpop.eup %3198 }
 0xc52   : > { %v2192_v24 = vpack.c.bf16 %v2188_v38, %v2188_v38  ;;  %v2187_v25 = vmul.f32 %v3199_v23, %v4146_v54  ;;  %v2181_v41 = vpop.xlane.xlu1 %2180 }
 0xc53   : > { %3200 = vrcp.f32 %v2181_v41 }
 0xc54   : > { %v2191_v26 = vpack.c.bf16 %v2187_v25, %v2187_v25  ;;  %2902 = vmatmul.msk.bf16.vlgmr.msra.gmra.mxu3 %vm1123_vm6, %v2192_v24 }
 0xc56   : > { %2901 = vmatmul.msk.bf16.vlgmr.msra.gmra.mxu2 %vm1123_vm6, %v2191_v26 }
 0xc59   : > { %v3201_v27 = vpop.eup %3200 }
 0xc5a   : > { %v2189_v49 = vmul.f32 %v3201_v27, %v4150_v56 }
 0xc5c   : > { %v2193_v28 = vpack.c.bf16 %v2189_v49, %v2189_v49 }
 0xc5e   : > { %2903 = vmatmul.msk.bf16.vlgmr.msrb.gmra.mxu0 %vm1123_vm6, %v2193_v28 }
 0xccd   : > { %v2209_v61 = vpop.f32.mrf.mxu1 }
 0xcce   : > { %v2272_v31 = vrot.slane %v2209_v61, 4 }
 0xcd5   : > { %v2211_v29 = vpop.f32.mrf.mxu1 }
 0xcd7   : > { %v2247_v32 = vpop.f32.mrf.mxu3 }
 0xcd8   : > { %v2270_v34 = vrot.slane %v2247_v32, 4  ;;  %v2273_v54 = vsel %vm757_vm5, %v2247_v32, %v2272_v31 }
 0xcd9   : > { %v2281_v35 = vperm.slane %v2273_v54, %v3754_v47  ;;  %v2228_v37 = vpop.f32.mrf.mxu2 }
 0xcda   : > { %v2271_v36 = vsel %vm757_vm5, %v2270_v34, %v2209_v61  ;;  %v2284_v39 = vrot.slane %v2228_v37, 4 }
 0xcdb   : > { %v2277_v42 = vperm.slane %v2271_v36, %v3754_v47  ;;  %v2266_v43 = vpop.f32.mrf.mxu0  ;;  %v2308_v45 = vrot.slane %v2281_v35, 4 }
 0xcdc   : > { %v2282_v56 = vrot.slane %v2266_v43, 4  ;;  %v2285_v44 = vsel %vm757_vm5, %v2266_v43, %v2284_v39  ;;  %v2986_v39 = vld [vmem:[%s4364_s5 + $0x18] sm:$0xff] }
 0xcdd   : > { %v2293_v46 = vperm.slane %v2285_v44, %v3754_v47  ;;  %v2296_v50 = vrot.slane %v2277_v42, 4  ;;  %2427 = vmatpush.bf16.msrb.mxu1 %v2986_v39 }
 0xcde   : > { %v2283_v48 = vsel %vm757_vm5, %v2282_v56, %v2228_v37 }
 0xcdf   : > { %v2289_v58 = vperm.slane %v2283_v48, %v3754_v47  ;;  %v2306_v30 = vrot.slane %v2293_v46, 4  ;;  %v2309_v52 = vsel %vm757_vm5, %v2293_v46, %v2308_v45  ;;  %v2249_v53 = vpop.f32.mrf.mxu3 }
 0xce0   : > { %v2317_v55 = vperm.slane %v2309_v52, %v3764_v62 }
 0xce1   : > { %v2294_v57 = vrot.slane %v2289_v58, 4  ;;  %v2297_v59 = vsel %vm757_vm5, %v2289_v58, %v2296_v50  ;;  %v2307_v60 = vsel %vm757_vm5, %v2306_v30, %v2281_v35  ;;  %v2230_v63 = vpop.f32.mrf.mxu2  ;;  %v3153_v50 = vld [vmem:[%s4365_s6 + $0x1] ss:$0 sm:$0xff] }
 0xce2   : > { %v2305_v0 = vperm.slane %v2297_v59, %v3764_v62  ;;  %v2313_v1 = vperm.slane %v2307_v60, %v3764_v62  ;;  %v2324_v2 = vrot.slane %v2317_v55, 4 }
 0xce3   : > { %v2295_v3 = vsel %vm757_vm5, %v2294_v57, %v2277_v42  ;;  %v2268_v4 = vpop.f32.mrf.mxu0 }
 0xce4   : > { %v2301_v5 = vperm.slane %v2295_v3, %v3764_v62  ;;  %v2320_v6 = vrot.slane %v2305_v0, 4  ;;  %v2322_v7 = vrot.slane %v2313_v1, 4  ;;  %v2325_v9 = vsel %vm757_vm5, 0.0, %v2324_v2 }
 0xce5   : > { %v2337_v10 = vsel %vm757_vm5, %v2324_v2, %v2313_v1  ;;  %v2342_v11 = vrot.slane %v2325_v9, 4  ;;  %v2988_v1 = vld [vmem:[%s4368_s9 + $0x18] sm:$0xff] }
 0xce6   : > { %v2318_v12 = vrot.slane %v2301_v5, 4  ;;  %v2321_v13 = vsel %vm757_vm5, 0.0, %v2320_v6  ;;  %v2323_v14 = vsel %vm757_vm5, 0.0, %v2322_v7  ;;  %v2341_v15 = vperm.slane %v2337_v10, %v3754_v47  ;;  %2501 = vmatpush.bf16.msrb.mxu2 %v2988_v1 }
 0xce7   : > { %v2331_v33 = vrot.slane %v2321_v13, 4  ;;  %v2326_v16 = vsel %vm757_vm5, %v2320_v6, %v2301_v5  ;;  %v2343_v40 = vsel %vm757_vm5, %v2342_v11, %v2323_v14  ;;  %v3155_v14 = vld [vmem:[%s4367_s8 + $0x1] ss:$0 sm:$0xff] }
 0xce8   : > { %v2319_v17 = vsel %vm757_vm5, 0.0, %v2318_v12  ;;  %v2330_v18 = vperm.slane %v2326_v16, %v3754_v47  ;;  %v2347_v19 = vperm.slane %v2343_v40, %v3754_v47  ;;  %v2362_v20 = vrot.slane %v2341_v15, 4  ;;  %v3154_v12 = vld [vmem:[#allocation7 + $0x1] ss:$0 sm:$0xff] }
 0xce9   : > { %v2332_v21 = vsel %vm757_vm5, %v2331_v33, %v2319_v17  ;;  %v2992_v17 = vld [vmem:[%s4370_s11 + $0x38] sm:$0xff] }
 0xcea   : > { %v2336_v22 = vperm.slane %v2332_v21, %v3754_v47  ;;  %v2350_v38 = vrot.slane %v2330_v18, 4  ;;  %v2363_v23 = vsel %vm757_vm5, %v2347_v19, %v2362_v20  ;;  %v2360_v24 = vrot.slane %v2347_v19, 4  ;;  %2563 = vmatpush.bf16.msrb.mxu3 %v2992_v17  ;;  %v2990_v19 = vld [vmem:[%s4370_s11 + $0x28] sm:$0xff]  ;;  %v2989_v20 = vld [vmem:[%s4370_s11 + $0x20] sm:$0xff] }
 0xceb   : > { %v2371_v25 = vperm.slane %v2363_v23, %v3764_v62  ;;  %v3156_v21 = vld [vmem:[%s4369_s10 + $0x1] ss:$0 sm:$0xff] }
 0xcec   : > { %v2351_v41 = vsel %vm757_vm5, %v2336_v22, %v2350_v38  ;;  %v2348_v26 = vrot.slane %v2336_v22, 4  ;;  %v2361_v27 = vsel %vm757_vm5, %v2360_v24, %v2341_v15 }
 0xced   : > { %v2359_v49 = vperm.slane %v2351_v41, %v3764_v62  ;;  %v2376_v28 = vrot.slane %v2371_v25, 4  ;;  %v2367_v61 = vperm.slane %v2361_v27, %v3764_v62 }
 0xcee   : > { %v2349_v29 = vsel %vm757_vm5, %v2348_v26, %v2330_v18  ;;  %v2991_v18 = vld [vmem:[%s4370_s11 + $0x30] sm:$0xff] }
 0xcef   : > { %v2377_v47 = vsel %vm757_vm5, %v2376_v28, %v2359_v49  ;;  %v2355_v31 = vperm.slane %v2349_v29, %v3764_v62  ;;  %v2372_v32 = vrot.slane %v2367_v61, 4  ;;  %v2378_v37 = vrot.slane %v2359_v49, 4  ;;  %v2985_v62 = vld [vmem:[%s4364_s5 + $0x10] sm:$0xff]  ;;  %2564 = vmatpush.bf16.msrb.mxu3 %v2991_v18 }
 0xcf0   : > { %2385 = vrot.lane.b32.xlu1 %v2377_v47, %s4421_s20  ;;  %2428 = vmatpush.bf16.msrb.mxu1 %v2985_v62  ;;  %s660_s20 = scalar_lea.vmem [#allocation11], %s4424_s15  ;;  %s3380_s15 = scalar_lea.hbm %s4426_s13, 16 }
 0xcf1   : > { %v2374_v34 = vrot.slane %v2355_v31, 4  ;;  %v2373_v54 = vsel %vm757_vm5, %v2372_v32, %v2355_v31  ;;  %v2379_v36 = vsel %vm757_vm5, %v2371_v25, %v2378_v37  ;;  %v3157_v31 = vld [vmem:[%s4371_s12 + $0x1] ss:$0 sm:$0xff]  ;;  %s2662_s22 = sshll.u32 %s660_s20, 4  ;;  %s2663_s22 = int_to_ptr.vmem [resolvable:$true] %s2662_s22 }
 0xcf3   : > { %v2375_v35 = vsel %vm757_vm5, %v2367_v61, %v2374_v34  ;;  %2565 = vmatpush.bf16.msrb.mxu3 %v2990_v19 }
 0xcf4   : > { %2381 = vrot.lane.b32.xlu2 %v2375_v35, %s4422_s16  ;;  %s2970_s16 = sshll.u32 %s3606_s21, 3 }
 0xcf5   : > { %s2660_s29 = scalar_lea.hbm %s4425_s27, %s2970_s16 }
 0xcf6   : > { %s2664_s26 = sshll.u32 %s2660_s29, 4  ;;  %s2665_s26 = int_to_ptr.hbm [resolvable:$true] %s2664_s26 }
 0xcf7   : > { %2566 = vmatpush.bf16.msrb.mxu3 %v2989_v20  ;;  %s3374_s0 = sshra.s32 %s2665_s26, 4  ;;  %s3375_s0 = int_to_ptr.hbm [resolvable:$true] %s3374_s0 }
 0xcf8   : > { %s3376_s7 = scalar_lea.hbm %s3375_s0, 8  ;;  %p3381_p12 = scmp.lt.s32.totalorder %s3375_s0, %s4426_s13 }
 0xcf9   : > { %p3377_p1 = scmp.ne.s32.totalorder %s3375_s0, %s3376_s7  ;;  %p3382_p7 = scmp.lt.s32.totalorder %s3380_s15, %s3376_s7 }
 0xcfb   : > { %p3378_p3 = pnand %p3377_p1, %p3669_p5  ;;  %p3383_p8 = por %p3382_p7, %p3381_p12 }
 0xcfc   : > { %2389 = vrot.lane.b32.xlu2 %v2379_v36, %s4423_s24 }
 0xcfd   : > { %p3379_p4 = pneg %p3378_p3 }
 0xcff   : > { %p3384_p9 = pnand %p3383_p8, %p3379_p4 }
 0xd4e   : > { %v2382_v42 = vpop.permute.xlu2 %2381 }
 0xd4f   : > { %v2392_v43 = vsel %vm1123_vm6, %v2373_v54, %v2382_v42 }
 0xd56   : > { %v2390_v44 = vpop.permute.xlu2 %2389 }
 0xd62   : > { %v2386_v56 = vpop.permute.xlu1 %2385 }
 0xd63   : > { %v2393_v45 = vsel %vm1448_vm8, %v2392_v43, %v2386_v56  ;;  %v2994_v56 = vld [vmem:[#allocation10 + $0x8] sm:$0xff] }
 0xd64   : > { %v2394_v46 = vsel %vm1450_vm9, %v2393_v45, %v2390_v44  ;;  %2635 = vmatpush.bf16.msra.mxu0 %v2994_v56  ;;  %v2993_v44 = vld [vmem:[#allocation10] sm:$0xff] }
 0xd65   : > { %v2395_v48 = vpack.c.bf16 %v2394_v46, %v2394_v46 }
 0xd67   : > { %2917 = vmatmul.msk.bf16.vlgmr.msrb.gmra.mxu1 %vm671_vm0, %v2395_v48 }
 0xd68   : > { %2636 = vmatpush.bf16.msra.mxu0 %v2993_v44 }
 0xde4   : > { %v2430_v58 = vpop.f32.mrf.mxu1 }
 0xde5   : > { %v2431_v30 = vadd.f32 %v3153_v50, %v2430_v58 }
 0xde7   : > { %v2434_v52 = vadd.f32 %v2431_v30, %v4023_v51  ;;  %v2987_v51 = vld [vmem:[%s4368_s9 + $0x10] sm:$0xff] }
 0xde8   : > { %2502 = vmatpush.bf16.msrb.mxu2 %v2987_v51 }
 0xde9   : > { %v2439_v53 = vsel %vm671_vm0, %v2434_v52, 0.0 }
 0xdea   : > { %2440 = vadd.xlane.f32.xlu1 %v2439_v53 }
 0xdec   : > { %v2432_v55 = vpop.f32.mrf.mxu1 }
 0xe5d   : > { %v2441_v57 = vpop.xlane.xlu1 %2440 }
 0xe5e   : > { %v2442_v59 = vmul.f32 %v2441_v57, %v3719_v8  ;;  %v3158_v57 = vld [vmem:[#allocation8 + $0x1] ss:$0 sm:$0xff] }
 0xe60   : > { %v2443_v60 = vsub.f32 %v2434_v52, %v2442_v59 }
 0xe62   : > { %v2444_v63 = vmul.f32 %v2443_v60, %v2443_v60 }
 0xe64   : > { %v2445_v0 = vsel %vm671_vm0, %v2444_v63, 0.0 }
 0xe65   : > { %2446 = vadd.xlane.f32.xlu0 %v2445_v0 }
 0xed8   : > { %v2447_v2 = vpop.xlane.xlu0 %2446 }
 0xed9   : > { %v2448_v3 = vmul.f32 %v2447_v2, %v3719_v8 }
 0xedb   : > { %v2449_v4 = vadd.f32 1e-12, %v2448_v3 }
 0xedd   : > { %3202 = vrsqrt.f32 %v2449_v4  ;;  %vm2456_vm3 = vweird.f32 %v2449_v4 }
 0xee3   : > { %v3203_v5 = vpop.eup %3202 }
 0xee4   : > { %v2451_v6 = vmul.f32 %v3203_v5, %v2449_v4  ;;  %vm2457_vm2 = vweird.f32 %v3203_v5 }
 0xee5   : > { %vm2458_vm4 = vmor %vm2456_vm3, %vm2457_vm2 }
 0xee6   : > { %v2452_v7 = vmul.f32 %v3203_v5, %v2451_v6 }
 0xee8   : > { %v2453_v9 = vmul.f32 0.5, %v2452_v7 }
 0xeea   : > { %v2454_v10 = vsub.f32 1.5, %v2453_v9 }
 0xeec   : > { %v2455_v11 = vmul.f32 %v3203_v5, %v2454_v10 }
 0xeee   : > { %v2459_v13 = vsel %vm2458_vm4, %v3203_v5, %v2455_v11 }
 0xeef   : > { %v2460_v15 = vmul.f32 %v2459_v13, %v2443_v60 }
 0xef1   : > { %v2464_v33 = vmul.f32 %v3154_v12, %v2460_v15 }
 0xef3   : > { %v2468_v16 = vadd.f32 %v3155_v14, %v2464_v33 }
 0xef5   : > { %v2469_v40 = vpack.c.bf16 %v2468_v16, %v2468_v16 }
 0xef7   : > { %2932 = vmatmul.msk.bf16.vlgmr.msrb.gmra.mxu2 %vm671_vm0, %v2469_v40 }
 0xf7a   : > { %v2504_v22 = vpop.f32.mrf.mxu2 }
 0xf7b   : > { %v2505_v38 = vadd.f32 %v3156_v21, %v2504_v22 }
 0xf7d   : > { %v2509_v23 = vmul.f32 0.044715, %v2505_v38  ;;  %v2508_v28 = vmul.f32 0.5, %v2505_v38 }
 0xf7f   : > { %v2510_v24 = vmul.f32 %v2509_v23, %v2505_v38 }
 0xf81   : > { %v2511_v25 = vmul.f32 %v2510_v24, %v2505_v38 }
 0xf82   : > { %v2506_v41 = vpop.f32.mrf.mxu2 }
 0xf83   : > { %v2512_v26 = vadd.f32 %v2511_v25, %v2505_v38 }
 0xf85   : > { %v2513_v27 = vmul.f32 0.7978846, %v2512_v26 }
 0xf87   : > { %3204 = vtanh.f32 %v2513_v27 }
 0xf8d   : > { %v3205_v49 = vpop.eup %3204 }
 0xf8e   : > { %v2515_v61 = vadd.f32 1.0, %v3205_v49 }
 0xf90   : > { %v2516_v29 = vmul.f32 %v2515_v61, %v2508_v28 }
 0xf92   : > { %v2517_v47 = vpack.c.bf16 %v2516_v29, %v2516_v29 }
 0xf94   : > { %2958 = vmatmul.msk.bf16.vlgmr.msrb.gmra.mxu3 %vm1605_vm13, %v2517_v47 }
0x1017   : > { %v2568_v32 = vpop.f32.mrf.mxu3 }
0x1018   : > { %v2569_v34 = vadd.f32 %v3157_v31, %v2568_v32 }
0x101a   : > { %v2572_v54 = vadd.f32 %v2569_v34, %v2468_v16 }
0x101c   : > { %v2577_v35 = vsel %vm671_vm0, %v2572_v54, 0.0 }
0x101d   : > { %2578 = vadd.xlane.f32.xlu2 %v2577_v35 }
0x101f   : > { %v2570_v37 = vpop.f32.mrf.mxu3 }
0x1090   : > { %v2579_v36 = vpop.xlane.xlu2 %2578 }
0x1091   : > { %v2580_v39 = vmul.f32 %v2579_v36, %v3719_v8 }
0x1093   : > { %v2581_v62 = vsub.f32 %v2572_v54, %v2580_v39 }
0x1095   : > { %v2582_v42 = vmul.f32 %v2581_v62, %v2581_v62 }
0x1097   : > { %v2583_v43 = vsel %vm671_vm0, %v2582_v42, 0.0 }
0x1098   : > { %2584 = vadd.xlane.f32.xlu0 %v2583_v43 }
0x110b   : > { %v2585_v45 = vpop.xlane.xlu0 %2584 }
0x110c   : > { %v2586_v46 = vmul.f32 %v2585_v45, %v3719_v8  ;;  %v3159_v8 = vld [vmem:[%s4373_s14 + $0x1] ss:$0 sm:$0xff] }
0x110e   : > { %v2587_v48 = vadd.f32 1e-12, %v2586_v46 }
0x1110   : > { %3206 = vrsqrt.f32 %v2587_v48  ;;  %vm2594_vm6 = vweird.f32 %v2587_v48 }
0x1116   : > { %v3207_v50 = vpop.eup %3206 }
0x1117   : > { %v2589_v58 = vmul.f32 %v3207_v50, %v2587_v48  ;;  %vm2595_vm5 = vweird.f32 %v3207_v50 }
0x1118   : > { %vm2596_vm7 = vmor %vm2594_vm6, %vm2595_vm5 }
0x1119   : > { %v2590_v30 = vmul.f32 %v3207_v50, %v2589_v58 }
0x111b   : > { %v2591_v52 = vmul.f32 0.5, %v2590_v30 }
0x111d   : > { %v2592_v53 = vsub.f32 1.5, %v2591_v52 }
0x111f   : > { %v2593_v55 = vmul.f32 %v3207_v50, %v2592_v53 }
0x1121   : > { %v2597_v59 = vsel %vm2596_vm7, %v3207_v50, %v2593_v55 }
0x1122   : > { %v2598_v60 = vmul.f32 %v2597_v59, %v2581_v62 }
0x1124   : > { %v2602_v63 = vmul.f32 %v3158_v57, %v2598_v60 }
0x1126   : > { %v2606_v0 = vadd.f32 %v3159_v8, %v2602_v63 }
0x1128   : > { %v2608_v1 = vpack.c.bf16 %v2606_v0, %v2606_v0  ;;  %2607 = vst.msk [vmem:[%s660_s20] sm:$0xff] %vm671_vm0, %v2606_v0 }
0x112a   : > { %2968 = vmatmul.msk.bf16.vlgmr.msra.gmra.mxu0 %vm671_vm0, %v2608_v1 }
0x112b   : > { %3387 = shalt.err (!%p3384_p9)
}
0x112c   : > { %3013 = dma.vmem_to_hbm [thread:$0]  (%p3669_p5), %s2663_s22, 128, %s2665_s26, %s2646_s2   ;;  %vm2643_vm0 = vcmask 253952  }
0x112d   : > { %s4427_s24 = sld [smem:[#allocation32_spill]]  ;;  %s666_s29 = scalar_lea.vmem [#allocation12], %s3700_s25 }
0x112e   : > { %s4428_s3 = sld [smem:[#allocation34_spill]]  ;;  %s2675_s0 = sshll.u32 %s666_s29, 4  ;;  %s2676_s0 = int_to_ptr.vmem [resolvable:$true] %s2675_s0 }
0x112f   : > { %s2651_s22 = scalar_lea.sflag [#allocation13], %s3700_s25 }
0x1133   : > { %v2613_v51 = vld [vmem:[%s4427_s24] sm:$0x1] }
0x1134   : > { %s2673_s4 = scalar_lea.hbm %s4428_s3, %s3606_s21  ;;  %s3408_s18 = scalar_lea.hbm %s4428_s3, 2 }
0x1135   : > { %s2677_s7 = sshll.u32 %s2673_s4, 4  ;;  %s2678_s7 = int_to_ptr.hbm [resolvable:$true] %s2677_s7 }
0x1136   : > { %s3402_s26 = sshra.s32 %s2678_s7, 4  ;;  %s3403_s26 = int_to_ptr.hbm [resolvable:$true] %s3402_s26 }
0x1137   : > { %s3404_s2 = scalar_lea.hbm %s3403_s26, 1  ;;  %p3409_p0 = scmp.lt.s32.totalorder %s3403_s26, %s4428_s3 }
0x1138   : > { %p3405_p10 = scmp.ne.s32.totalorder %s3403_s26, %s3404_s2  ;;  %p3410_p2 = scmp.lt.s32.totalorder %s3408_s18, %s3404_s2 }
0x113a   : > { %p3406_p13 = pnand %p3405_p10, %p3669_p5  ;;  %p3411_p1 = por %p3410_p2, %p3409_p0 }
0x113c   : > { %p3407_p11 = pneg %p3406_p13 }
0x113e   : > { %p3412_p3 = pnand %p3411_p1, %p3407_p11 }
0x11a7   : > { %v2638_v2 = vpop.f32.mrf.mxu0 }
0x11a8   : > { %v2639_v3 = vadd.f32 %v2638_v2, %v2613_v51 }
0x11aa   : > { %3208 = vtanh.f32 %v2639_v3 }
0x11af   : > { %v2640_v4 = vpop.f32.mrf.mxu0 }
0x11b0   : > { %v3209_v5 = vpop.eup %3208 }
0x11b1   : > { %2644 = vst.msk [vmem:[%s666_s29] sm:$0x1] %vm2643_vm0, %v3209_v5 }
0x11b2   : > { %3415 = shalt.err (!%p3412_p3)
}
0x11b3   : > { %3014 = dma.vmem_to_hbm [thread:$0]  (%p3669_p5), %s2676_s0, 16, %s2678_s7, %s2651_s22  }
0x11b4 PF: > { %s4429_s25 = sld [smem:[#allocation19_spill]]  ;;  %p4431_p4 = scmp.ge.s32.totalorder %s3466_s30, 2 }
0x11b6   : > { %p3035_p12 = pnand %p4431_p4, %p3673_p6 }
0x11b8   : > { %p3036_p7 = pneg %p3035_p12 }
0x11ba   : > { %s2689_s24 = sand.u32 1, %s4429_s25  }
0x11bb   : > { %s2690_s1 = scalar_lea.sflag [#allocation4], %s2689_s24 }
0x11bc   : > { %3445 = dma.done.wait (%p3036_p7), %s2690_s1, 128  }
0x11bd   : > { %3447 = vsyncadd (%p3036_p7), %s2690_s1, 4294967168  ;;  %s2700_s27 = scalar_lea.sflag [#allocation13], %s2689_s24 }
0x11be   : > { %3449 = dma.done.wait (%p3036_p7), %s2700_s27, 16  }
0x11bf   : > { %3451 = vsyncadd (%p3036_p7), %s2700_s27, 4294967280  ;;  %s4432_s30 = sld [smem:[#allocation21_spill]]  ;;  %s4435_s27 = smov %s3458_s28 }
0x11c0   : > { %s4433_s4 = sld [smem:[#allocation20_spill]] }
0x11c1   : > { %s4434_s29 = sld [smem:[#allocation22_spill]] }
0x11c5   : > { %p37_p5 = scmp.ge.s32.totalorder %s4432_s30, 4  }
0x11c6   : > { %s4436_s28 = smov %s4433_s4 }
0x11c7   :  { %39 = sbr.rel (!%p37_p5) target bundleno = 21 (0x15), region = 178 }
0x11cc   :  { %2705 = vsyncpa [#allocation3], 1 }
0x11cd   :  { %2707 = vsyncpa [#allocation3 + $0x1], 1 }
0x11ce   :  { %2708 = vsyncpa [#allocation6], 1 }
0x11cf   :  { %2709 = vsyncpa [#allocation9], 1 }
0x11d0   :  { %2710 = vsyncpa [#allocation4], 1 }
0x11d1   :  { %2712 = vsyncpa [#allocation4 + $0x1], 1 }
0x11d2   :  { %2713 = vsyncpa [#allocation13], 1 }
0x11d3   :  { %2715 = vsyncpa [#allocation13 + $0x1], 1 }

</bundles_post_ra>
